<compile_context>
chip_gen: v6e
topology: v6e:2x2x1
jax: 0.10.0
libtpu: 0.0.40
codegen_flags: <defaults>
</compile_context>

<pallas_src>
import functools
import math

import jax
import jax.numpy as jnp
from jax.experimental import pallas as pl
from jax.experimental.pallas import tpu as pltpu


# --------------------------------------------------------------------------- #
# Kernel 1a: fused QKV projection for self-attention (single x input).
#   grid = (B,);  x block (S, D);  weights (D, D) bf16 (resident);  bias (1, D)
#   outputs q/k/v written directly in (B, S, D) concat layout, bf16.
# --------------------------------------------------------------------------- #
def _qkv_proj_self_kernel(x_ref, wq_ref, wk_ref, wv_ref,
                          bq_ref, bk_ref, bv_ref,
                          q_ref, k_ref, v_ref):
    x = x_ref[...].astype(jnp.bfloat16)

    def proj(w_ref, b_ref):
        acc = jnp.dot(x, w_ref[...], preferred_element_type=jnp.float32)
        return (acc + b_ref[...]).astype(q_ref.dtype)   # (S, D) + (1, D) broadcast

    q_ref[...] = proj(wq_ref, bq_ref)
    k_ref[...] = proj(wk_ref, bk_ref)
    v_ref[...] = proj(wv_ref, bv_ref)


# --------------------------------------------------------------------------- #
# Kernel 1b: single linear projection (general / cross-attention path).
# --------------------------------------------------------------------------- #
def _linear_proj_kernel(x_ref, w_ref, b_ref, o_ref):
    acc = jnp.dot(x_ref[...].astype(jnp.bfloat16), w_ref[...],
                  preferred_element_type=jnp.float32)
    o_ref[...] = (acc + b_ref[...]).astype(o_ref.dtype)


def _linear_project(x, w_bf16, b):
    B, S, D = x.shape
    return pl.pallas_call(
        _linear_proj_kernel,
        out_shape=jax.ShapeDtypeStruct((B, S, D), jnp.bfloat16),
        grid=(B,),
        in_specs=[pl.BlockSpec((None, S, D), lambda b_: (b_, 0, 0)),
                  pl.BlockSpec((D, D), lambda b_: (0, 0)),
                  pl.BlockSpec((1, D), lambda b_: (0, 0))],
        out_specs=pl.BlockSpec((None, S, D), lambda b_: (b_, 0, 0)),
        compiler_params=pltpu.CompilerParams(dimension_semantics=("parallel",)),
    )(x, w_bf16, b)


# --------------------------------------------------------------------------- #
# Kernel 2: scaled dot-product attention for one (batch, head, query-tile).
#   q block (tq, dh); k/v blocks (S_kv, dh) (resident across the query tiles);
#   outputs: attention weights (tq, S_kv) f32 and PV result (tq, dh) written
#   straight into the (B, S_q, D) concat layout at head-column h.
# --------------------------------------------------------------------------- #
def _attention_kernel(q_ref, k_ref, v_ref, wts_ref, o_ref, *, scale):
    # Fold 1/sqrt(dh) into q (tq*dh multiplies instead of tq*S_kv).
    q = (q_ref[...].astype(jnp.float32) * scale).astype(jnp.bfloat16)
    k = k_ref[...]                                    # (S_kv, dh) bf16
    v = v_ref[...]                                    # (S_kv, dh) bf16

    # Q @ K^T on the MXU (contract last dims), f32 accumulation.
    logits = jax.lax.dot_general(
        q, k, (((1,), (1,)), ((), ())),
        preferred_element_type=jnp.float32)           # (tq, S_kv)

    # Numerically stable softmax (EUP exp, XLU row reductions, EUP reciprocal).
    m = jnp.max(logits, axis=-1, keepdims=True)
    p = jnp.exp(logits - m)
    denom = jnp.sum(p, axis=-1, keepdims=True)
    weights = p * pl.reciprocal(denom, approx=True)

    wts_ref[...] = weights.astype(wts_ref.dtype)
    o_ref[...] = jnp.dot(weights.astype(jnp.bfloat16), v,
                         preferred_element_type=jnp.float32).astype(o_ref.dtype)


# --------------------------------------------------------------------------- #
# Kernel 3: output projection fc — one full-width (S, D) @ (D, D) per batch.
# --------------------------------------------------------------------------- #
def _out_proj_kernel(a_ref, w_ref, b_ref, o_ref):
    acc = jnp.dot(a_ref[...], w_ref[...], preferred_element_type=jnp.float32)
    o_ref[...] = (acc + b_ref[...]).astype(o_ref.dtype)


# --------------------------------------------------------------------------- #
# Shared attention + output projection (kernels 2 and 3).
# --------------------------------------------------------------------------- #
def _attention_and_output(qh, kh, vh, wo_bf16, bo, *, num_heads):
    B, S_q, D = qh.shape
    _, S_kv, _ = kh.shape
    H = num_heads
    dh = D // H
    scale = float(1.0 / math.sqrt(dh))

    # Query tile: keeps the (tq, S_kv) weights block small at large S (v7x VMEM).
    tq = S_q if S_q <= 512 else 512
    assert S_q % tq == 0, "seq_len must be a multiple of the query tile"
    nq = S_q // tq

    q_spec = pl.BlockSpec((None, tq, dh), lambda b, h, qi: (b, qi, h))
    kv_spec = pl.BlockSpec((None, S_kv, dh), lambda b, h, qi: (b, 0, h))
    wts_spec = pl.BlockSpec((None, None, tq, S_kv), lambda b, h, qi: (b, h, qi, 0))
    o_spec = pl.BlockSpec((None, tq, dh), lambda b, h, qi: (b, qi, h))

    attn_wts, attn_concat = pl.pallas_call(
        functools.partial(_attention_kernel, scale=scale),
        out_shape=(jax.ShapeDtypeStruct((B, H, S_q, S_kv), jnp.float32),
                   jax.ShapeDtypeStruct((B, S_q, D), jnp.bfloat16)),
        grid=(B, H, nq),
        in_specs=[q_spec, kv_spec, kv_spec],
        out_specs=(wts_spec, o_spec),
        compiler_params=pltpu.CompilerParams(
            dimension_semantics=("parallel", "parallel", "parallel"),
            vmem_limit_bytes=48 * 1024 * 1024),
    )(qh, kh, vh)

    out = pl.pallas_call(
        _out_proj_kernel,
        out_shape=jax.ShapeDtypeStruct((B, S_q, D), jnp.float32),
        grid=(B,),
        in_specs=[pl.BlockSpec((None, S_q, D), lambda b: (b, 0, 0)),
                  pl.BlockSpec((D, D), lambda b: (0, 0)),
                  pl.BlockSpec((1, D), lambda b: (0, 0))],
        out_specs=pl.BlockSpec((None, S_q, D), lambda b: (b, 0, 0)),
        compiler_params=pltpu.CompilerParams(dimension_semantics=("parallel",)),
    )(attn_concat, wo_bf16, bo)

    return out, attn_wts


# --------------------------------------------------------------------------- #
# Public wrappers
# --------------------------------------------------------------------------- #
def _cast_weights(params):
    bf16 = jnp.bfloat16
    return (params["wq"].astype(bf16), params["wk"].astype(bf16),
            params["wv"].astype(bf16), params["wo"].astype(bf16))


def _check_dims(D, num_heads):
    assert D % num_heads == 0, "d_model must be divisible by num_heads"
    dh = D // num_heads
    assert dh % 128 == 0 or num_heads == 1, (
        "this kernel expects depth = d_model // num_heads to be a multiple of 128")
    return dh


def multihead_self_attention_forward(x, params, *, num_heads):
    """Self-attention fast path (q = k = v = x): x is read once per batch."""
    B, S, D = x.shape
    _check_dims(D, num_heads)
    wq_b, wk_b, wv_b, wo_b = _cast_weights(params)
    bq, bk, bv, bo = params["bq"], params["bk"], params["bv"], params["bo"]

    x_spec = pl.BlockSpec((None, S, D), lambda b: (b, 0, 0))
    w_spec = pl.BlockSpec((D, D), lambda b: (0, 0))      # resident across batch steps
    b_spec = pl.BlockSpec((1, D), lambda b: (0, 0))
    o_spec = pl.BlockSpec((None, S, D), lambda b: (b, 0, 0))

    qh, kh, vh = pl.pallas_call(
        _qkv_proj_self_kernel,
        out_shape=(jax.ShapeDtypeStruct((B, S, D), jnp.bfloat16),) * 3,
        grid=(B,),
        in_specs=[x_spec, w_spec, w_spec, w_spec, b_spec, b_spec, b_spec],
        out_specs=(o_spec, o_spec, o_spec),
        compiler_params=pltpu.CompilerParams(dimension_semantics=("parallel",)),
    )(x, wq_b, wk_b, wv_b, bq, bk, bv)

    return _attention_and_output(qh, kh, vh, wo_b, bo, num_heads=num_heads)


def multihead_attention_forward(q_in, k_in, v_in, params, *, num_heads):
    """General path. q_in (B,Sq,D), k_in/v_in (B,Skv,D). Returns (out, weights)."""
    if q_in is k_in and k_in is v_in:           # concrete-array self-attention fast path
        return multihead_self_attention_forward(q_in, params, num_heads=num_heads)

    _check_dims(q_in.shape[-1], num_heads)
    wq_b, wk_b, wv_b, wo_b = _cast_weights(params)
    qh = _linear_project(q_in, wq_b, params["bq"])
    kh = _linear_project(k_in, wk_b, params["bk"])
    vh = _linear_project(v_in, wv_b, params["bv"])
    return _attention_and_output(qh, kh, vh, wo_b, params["bo"], num_heads=num_heads)


# --------------------------------------------------------------------------- #
# Pure-JAX reference (same math as the PyTorch module in eval mode, no masks).
# --------------------------------------------------------------------------- #
def reference_mha(q_in, k_in, v_in, params, num_heads):
    B, S, D = q_in.shape
    H = num_heads
    dh = D // H

    def linear(x, w, b):
        return jnp.einsum("bsd,de->bse", x, w) + b.reshape(1, 1, D)

    def split_heads(x):
        return x.reshape(B, -1, H, dh).transpose(0, 2, 1, 3)

    q = split_heads(linear(q_in, params["wq"], params["bq"]))
    k = split_heads(linear(k_in, params["wk"], params["bk"]))
    v = split_heads(linear(v_in, params["wv"], params["bv"]))

    logits = jnp.einsum("bhqd,bhkd->bhqk", q, k) / math.sqrt(dh)
    wts = jax.nn.softmax(logits, axis=-1)
    attn = jnp.einsum("bhqk,bhkd->bhqd", wts, v)
    concat = attn.transpose(0, 2, 1, 3).reshape(B, S, D)
    out = jnp.einsum("bsd,de->bse", concat, params["wo"]) + params["bo"].reshape(1, 1, D)
    return out, wts


if __name__ == "__main__":
    # Small but lane-dense shapes: depth = d_model // num_heads = 128.
    B, S, D, H = 2, 128, 256, 2

    key = jax.random.PRNGKey(0)
    keys = jax.random.split(key, 10)
    w_scale = 1.0 / math.sqrt(D)
    params = {
        "wq": jax.random.normal(keys[0], (D, D), jnp.float32) * w_scale,
        "wk": jax.random.normal(keys[1], (D, D), jnp.float32) * w_scale,
        "wv": jax.random.normal(keys[2], (D, D), jnp.float32) * w_scale,
        "wo": jax.random.normal(keys[3], (D, D), jnp.float32) * w_scale,
        "bq": jax.random.normal(keys[4], (1, D), jnp.float32) * 0.02,
        "bk": jax.random.normal(keys[5], (1, D), jnp.float32) * 0.02,
        "bv": jax.random.normal(keys[6], (1, D), jnp.float32) * 0.02,
        "bo": jax.random.normal(keys[7], (1, D), jnp.float32) * 0.02,
    }
    x = jax.random.normal(keys[8], (B, S, D), dtype=jnp.float32)
    y = jax.random.normal(keys[9], (B, S, D), dtype=jnp.float32)

    # bf16 MXU operands (both in the kernels and in XLA's default-precision
    # reference) put errors in the ~1e-2 absolute regime -> 2e-2 tolerance.
    ATOL = RTOL = 2e-2

    # ---- self-attention fast path (q = k = v = x) ---------------------------
    mha_self = jax.jit(functools.partial(multihead_self_attention_forward, num_heads=H))
    out, attn_wts = jax.block_until_ready(mha_self(x, params))
    ref_out, ref_wts = reference_mha(x, x, x, params, H)

    assert out.shape == (B, S, D)
    assert attn_wts.shape == (B, H, S, S)
    assert jnp.allclose(out, ref_out, atol=ATOL, rtol=RTOL), "self-attn output mismatch"
    assert jnp.allclose(attn_wts, ref_wts, atol=ATOL, rtol=RTOL), "self-attn weights mismatch"

    # ---- general path (cross-attention: q = x, k = v = y) -------------------
    mha_gen = jax.jit(functools.partial(multihead_attention_forward, num_heads=H))
    out2, attn_wts2 = jax.block_until_ready(mha_gen(x, y, y, params))
    ref_out2, ref_wts2 = reference_mha(x, y, y, params, H)

    assert jnp.allclose(out2, ref_out2, atol=ATOL, rtol=RTOL), "cross-attn output mismatch"
    assert jnp.allclose(attn_wts2, ref_wts2, atol=ATOL, rtol=RTOL), "cross-attn weights mismatch"

    print("KERNEL_OK")
</pallas_src>

<mosaic_0001>
module attributes {stable_mosaic.version = 11 : i64} {
  func.func @_attention_kernel(%arg0: i32, %arg1: i32, %arg2: i32, %arg3: memref<1x128x128xbf16, #tpu.memory_space<vmem>>, %arg4: memref<1x128x128xbf16, #tpu.memory_space<vmem>>, %arg5: memref<1x128x128xbf16, #tpu.memory_space<vmem>>, %arg6: memref<1x1x128x128xf32, #tpu.memory_space<vmem>>, %arg7: memref<1x128x128xbf16, #tpu.memory_space<vmem>>) attributes {dimension_semantics = [#tpu.dimension_semantics<parallel>, #tpu.dimension_semantics<parallel>, #tpu.dimension_semantics<parallel>], iteration_bounds = array<i64: 2, 2, 1>, scalar_prefetch = 0 : i64, scratch_operands = 0 : i64, tpu.core_type = #tpu.core_type<tc>, window_params = [{transform_indices = @transform_0, window_bounds = array<i64: 1, 128, 128>}, {transform_indices = @transform_1, window_bounds = array<i64: 1, 128, 128>}, {transform_indices = @transform_2, window_bounds = array<i64: 1, 128, 128>}, {transform_indices = @transform_3, window_bounds = array<i64: 1, 1, 128, 128>}, {transform_indices = @transform_4, window_bounds = array<i64: 1, 128, 128>}]} {
    %c0 = arith.constant 0 : index
    %c0_0 = arith.constant 0 : index
    %c0_1 = arith.constant 0 : index
    %0 = vector.load %arg3[%c0, %c0_0, %c0_1] : memref<1x128x128xbf16, #tpu.memory_space<vmem>>, vector<1x128x128xbf16>
    %1 = vector.shape_cast %0 : vector<1x128x128xbf16> to vector<128x128xbf16>
    %2 = arith.extf %1 : vector<128x128xbf16> to vector<128x128xf32>
    %cst = arith.constant 0.0883883461 : f32
    %3 = vector.broadcast %cst : f32 to vector<128x128xf32>
    %4 = arith.mulf %2, %3 : vector<128x128xf32>
    %5 = arith.truncf %4 : vector<128x128xf32> to vector<128x128xbf16>
    %c0_2 = arith.constant 0 : index
    %c0_3 = arith.constant 0 : index
    %c0_4 = arith.constant 0 : index
    %6 = vector.load %arg4[%c0_2, %c0_3, %c0_4] : memref<1x128x128xbf16, #tpu.memory_space<vmem>>, vector<1x128x128xbf16>
    %7 = vector.shape_cast %6 : vector<1x128x128xbf16> to vector<128x128xbf16>
    %c0_5 = arith.constant 0 : index
    %c0_6 = arith.constant 0 : index
    %c0_7 = arith.constant 0 : index
    %8 = vector.load %arg5[%c0_5, %c0_6, %c0_7] : memref<1x128x128xbf16, #tpu.memory_space<vmem>>, vector<1x128x128xbf16>
    %9 = vector.shape_cast %8 : vector<1x128x128xbf16> to vector<128x128xbf16>
    %cst_8 = arith.constant dense<0.000000e+00> : vector<128x128xf32>
    %10 = tpu.matmul %5, %7, %cst_8 {dimension_numbers = #tpu.dot_dimension_numbers<[1], [1], [0], [0], [0, 0, 1, 0], [], []>} : vector<128x128xbf16>, vector<128x128xbf16>, vector<128x128xf32> -> vector<128x128xf32>
    %cst_9 = arith.constant dense<0xFF800000> : vector<128xf32>
    %11 = vector.multi_reduction <maximumf>, %10, %cst_9 [1] : vector<128x128xf32> to vector<128xf32>
    %12 = vector.shape_cast %11 : vector<128xf32> to vector<128x1xf32>
    %13 = vector.broadcast %12 : vector<128x1xf32> to vector<128x128xf32>
    %14 = arith.subf %10, %13 : vector<128x128xf32>
    %15 = math.exp %14 : vector<128x128xf32>
    %cst_10 = arith.constant dense<0.000000e+00> : vector<128xf32>
    %16 = vector.multi_reduction <add>, %15, %cst_10 [1] : vector<128x128xf32> to vector<128xf32>
    %17 = vector.shape_cast %16 : vector<128xf32> to vector<128x1xf32>
    %18 = tpu.reciprocal %17 {approx = true} : vector<128x1xf32> -> vector<128x1xf32>
    %19 = vector.broadcast %18 : vector<128x1xf32> to vector<128x128xf32>
    %20 = arith.mulf %15, %19 : vector<128x128xf32>
    %c0_11 = arith.constant 0 : index
    %c0_12 = arith.constant 0 : index
    %c0_13 = arith.constant 0 : index
    %c0_14 = arith.constant 0 : index
    %21 = vector.load %arg6[%c0_11, %c0_12, %c0_13, %c0_14] : memref<1x1x128x128xf32, #tpu.memory_space<vmem>>, vector<1x1x128x128xf32>
    %22 = vector.shape_cast %21 : vector<1x1x128x128xf32> to vector<128x128xf32>
    %23 = vector.shape_cast %20 : vector<128x128xf32> to vector<1x1x128x128xf32>
    tpu.vector_store %arg6[%c0_11, %c0_12, %c0_13, %c0_14], %23 {strides = array<i32>} : memref<1x1x128x128xf32, #tpu.memory_space<vmem>>, vector<1x1x128x128xf32>,
    %24 = arith.truncf %20 : vector<128x128xf32> to vector<128x128xbf16>
    %cst_15 = arith.constant dense<0.000000e+00> : vector<128x128xf32>
    %25 = tpu.matmul %24, %9, %cst_15 {dimension_numbers = #tpu.dot_dimension_numbers<[1], [0], [0], [1], [0, 0, 1, 1], [], []>} : vector<128x128xbf16>, vector<128x128xbf16>, vector<128x128xf32> -> vector<128x128xf32>
    %26 = arith.truncf %25 : vector<128x128xf32> to vector<128x128xbf16>
    %c0_16 = arith.constant 0 : index
    %c0_17 = arith.constant 0 : index
    %c0_18 = arith.constant 0 : index
    %27 = vector.load %arg7[%c0_16, %c0_17, %c0_18] : memref<1x128x128xbf16, #tpu.memory_space<vmem>>, vector<1x128x128xbf16>
    %28 = vector.shape_cast %27 : vector<1x128x128xbf16> to vector<128x128xbf16>
    %29 = vector.shape_cast %26 : vector<128x128xbf16> to vector<1x128x128xbf16>
    tpu.vector_store %arg7[%c0_16, %c0_17, %c0_18], %29 {strides = array<i32>} : memref<1x128x128xbf16, #tpu.memory_space<vmem>>, vector<1x128x128xbf16>,
    return
  }
  func.func @transform_0(%arg0: i32, %arg1: i32, %arg2: i32) -> (i32, i32, i32) {
    %c0_i32 = arith.constant 0 : i32
    return %arg0, %arg2, %arg1 : i32, i32, i32
  }
  func.func @transform_1(%arg0: i32, %arg1: i32, %arg2: i32) -> (i32, i32, i32) {
    %c0_i32 = arith.constant 0 : i32
    %c0_i32_0 = arith.constant 0 : i32
    return %arg0, %c0_i32, %arg1 : i32, i32, i32
  }
  func.func @transform_2(%arg0: i32, %arg1: i32, %arg2: i32) -> (i32, i32, i32) {
    %c0_i32 = arith.constant 0 : i32
    %c0_i32_0 = arith.constant 0 : i32
    return %arg0, %c0_i32, %arg1 : i32, i32, i32
  }
  func.func @transform_3(%arg0: i32, %arg1: i32, %arg2: i32) -> (i32, i32, i32, i32) {
    %c0_i32 = arith.constant 0 : i32
    %c0_i32_0 = arith.constant 0 : i32
    return %arg0, %arg1, %arg2, %c0_i32 : i32, i32, i32, i32
  }
  func.func @transform_4(%arg0: i32, %arg1: i32, %arg2: i32) -> (i32, i32, i32) {
    %c0_i32 = arith.constant 0 : i32
    return %arg0, %arg2, %arg1 : i32, i32, i32
  }
}

module attributes {stable_mosaic.version = 11 : i64} {
  func.func @_qkv_proj_self_kernel(%arg0: i32, %arg1: memref<1x128x256xf32, #tpu.memory_space<vmem>>, %arg2: memref<256x256xbf16, #tpu.memory_space<vmem>>, %arg3: memref<256x256xbf16, #tpu.memory_space<vmem>>, %arg4: memref<256x256xbf16, #tpu.memory_space<vmem>>, %arg5: memref<1x256xf32, #tpu.memory_space<vmem>>, %arg6: memref<1x256xf32, #tpu.memory_space<vmem>>, %arg7: memref<1x256xf32, #tpu.memory_space<vmem>>, %arg8: memref<1x128x256xbf16, #tpu.memory_space<vmem>>, %arg9: memref<1x128x256xbf16, #tpu.memory_space<vmem>>, %arg10: memref<1x128x256xbf16, #tpu.memory_space<vmem>>) attributes {dimension_semantics = [#tpu.dimension_semantics<parallel>], iteration_bounds = array<i64: 2>, scalar_prefetch = 0 : i64, scratch_operands = 0 : i64, tpu.core_type = #tpu.core_type<tc>, window_params = [{transform_indices = @transform_0, window_bounds = array<i64: 1, 128, 256>}, {pipeline_mode = #tpu.pipeline_mode<synchronous>, transform_indices = @transform_1, window_bounds = array<i64: 256, 256>}, {pipeline_mode = #tpu.pipeline_mode<synchronous>, transform_indices = @transform_2, window_bounds = array<i64: 256, 256>}, {pipeline_mode = #tpu.pipeline_mode<synchronous>, transform_indices = @transform_3, window_bounds = array<i64: 256, 256>}, {pipeline_mode = #tpu.pipeline_mode<synchronous>, transform_indices = @transform_4, window_bounds = array<i64: 1, 256>}, {pipeline_mode = #tpu.pipeline_mode<synchronous>, transform_indices = @transform_5, window_bounds = array<i64: 1, 256>}, {pipeline_mode = #tpu.pipeline_mode<synchronous>, transform_indices = @transform_6, window_bounds = array<i64: 1, 256>}, {transform_indices = @transform_7, window_bounds = array<i64: 1, 128, 256>}, {transform_indices = @transform_8, window_bounds = array<i64: 1, 128, 256>}, {transform_indices = @transform_9, window_bounds = array<i64: 1, 128, 256>}]} {
    %c0 = arith.constant 0 : index
    %c0_0 = arith.constant 0 : index
    %c0_1 = arith.constant 0 : index
    %0 = vector.load %arg1[%c0, %c0_0, %c0_1] : memref<1x128x256xf32, #tpu.memory_space<vmem>>, vector<1x128x256xf32>
    %1 = vector.shape_cast %0 : vector<1x128x256xf32> to vector<128x256xf32>
    %2 = arith.truncf %1 : vector<128x256xf32> to vector<128x256xbf16>
    %c0_2 = arith.constant 0 : index
    %c0_3 = arith.constant 0 : index
    %3 = vector.load %arg2[%c0_2, %c0_3] : memref<256x256xbf16, #tpu.memory_space<vmem>>, vector<256x256xbf16>
    %cst = arith.constant dense<0.000000e+00> : vector<128x256xf32>
    %4 = tpu.matmul %2, %3, %cst {dimension_numbers = #tpu.dot_dimension_numbers<[1], [0], [0], [1], [0, 0, 1, 1], [], []>} : vector<128x256xbf16>, vector<256x256xbf16>, vector<128x256xf32> -> vector<128x256xf32>
    %c0_4 = arith.constant 0 : index
    %c0_5 = arith.constant 0 : index
    %5 = vector.load %arg5[%c0_4, %c0_5] : memref<1x256xf32, #tpu.memory_space<vmem>>, vector<1x256xf32>
    %6 = vector.broadcast %5 : vector<1x256xf32> to vector<128x256xf32>
    %7 = arith.addf %4, %6 : vector<128x256xf32>
    %8 = arith.truncf %7 : vector<128x256xf32> to vector<128x256xbf16>
    %c0_6 = arith.constant 0 : index
    %c0_7 = arith.constant 0 : index
    %c0_8 = arith.constant 0 : index
    %9 = vector.load %arg8[%c0_6, %c0_7, %c0_8] : memref<1x128x256xbf16, #tpu.memory_space<vmem>>, vector<1x128x256xbf16>
    %10 = vector.shape_cast %9 : vector<1x128x256xbf16> to vector<128x256xbf16>
    %11 = vector.shape_cast %8 : vector<128x256xbf16> to vector<1x128x256xbf16>
    tpu.vector_store %arg8[%c0_6, %c0_7, %c0_8], %11 {strides = array<i32>} : memref<1x128x256xbf16, #tpu.memory_space<vmem>>, vector<1x128x256xbf16>,
    %c0_9 = arith.constant 0 : index
    %c0_10 = arith.constant 0 : index
    %12 = vector.load %arg3[%c0_9, %c0_10] : memref<256x256xbf16, #tpu.memory_space<vmem>>, vector<256x256xbf16>
    %cst_11 = arith.constant dense<0.000000e+00> : vector<128x256xf32>
    %13 = tpu.matmul %2, %12, %cst_11 {dimension_numbers = #tpu.dot_dimension_numbers<[1], [0], [0], [1], [0, 0, 1, 1], [], []>} : vector<128x256xbf16>, vector<256x256xbf16>, vector<128x256xf32> -> vector<128x256xf32>
    %c0_12 = arith.constant 0 : index
    %c0_13 = arith.constant 0 : index
    %14 = vector.load %arg6[%c0_12, %c0_13] : memref<1x256xf32, #tpu.memory_space<vmem>>, vector<1x256xf32>
    %15 = vector.broadcast %14 : vector<1x256xf32> to vector<128x256xf32>
    %16 = arith.addf %13, %15 : vector<128x256xf32>
    %17 = arith.truncf %16 : vector<128x256xf32> to vector<128x256xbf16>
    %c0_14 = arith.constant 0 : index
    %c0_15 = arith.constant 0 : index
    %c0_16 = arith.constant 0 : index
    %18 = vector.load %arg9[%c0_14, %c0_15, %c0_16] : memref<1x128x256xbf16, #tpu.memory_space<vmem>>, vector<1x128x256xbf16>
    %19 = vector.shape_cast %18 : vector<1x128x256xbf16> to vector<128x256xbf16>
    %20 = vector.shape_cast %17 : vector<128x256xbf16> to vector<1x128x256xbf16>
    tpu.vector_store %arg9[%c0_14, %c0_15, %c0_16], %20 {strides = array<i32>} : memref<1x128x256xbf16, #tpu.memory_space<vmem>>, vector<1x128x256xbf16>,
    %c0_17 = arith.constant 0 : index
    %c0_18 = arith.constant 0 : index
    %21 = vector.load %arg4[%c0_17, %c0_18] : memref<256x256xbf16, #tpu.memory_space<vmem>>, vector<256x256xbf16>
    %cst_19 = arith.constant dense<0.000000e+00> : vector<128x256xf32>
    %22 = tpu.matmul %2, %21, %cst_19 {dimension_numbers = #tpu.dot_dimension_numbers<[1], [0], [0], [1], [0, 0, 1, 1], [], []>} : vector<128x256xbf16>, vector<256x256xbf16>, vector<128x256xf32> -> vector<128x256xf32>
    %c0_20 = arith.constant 0 : index
    %c0_21 = arith.constant 0 : index
    %23 = vector.load %arg7[%c0_20, %c0_21] : memref<1x256xf32, #tpu.memory_space<vmem>>, vector<1x256xf32>
    %24 = vector.broadcast %23 : vector<1x256xf32> to vector<128x256xf32>
    %25 = arith.addf %22, %24 : vector<128x256xf32>
    %26 = arith.truncf %25 : vector<128x256xf32> to vector<128x256xbf16>
    %c0_22 = arith.constant 0 : index
    %c0_23 = arith.constant 0 : index
    %c0_24 = arith.constant 0 : index
    %27 = vector.load %arg10[%c0_22, %c0_23, %c0_24] : memref<1x128x256xbf16, #tpu.memory_space<vmem>>, vector<1x128x256xbf16>
    %28 = vector.shape_cast %27 : vector<1x128x256xbf16> to vector<128x256xbf16>
    %29 = vector.shape_cast %26 : vector<128x256xbf16> to vector<1x128x256xbf16>
    tpu.vector_store %arg10[%c0_22, %c0_23, %c0_24], %29 {strides = array<i32>} : memref<1x128x256xbf16, #tpu.memory_space<vmem>>, vector<1x128x256xbf16>,
    return
  }
  func.func @transform_0(%arg0: i32) -> (i32, i32, i32) {
    %c0_i32 = arith.constant 0 : i32
    %c0_i32_0 = arith.constant 0 : i32
    %c0_i32_1 = arith.constant 0 : i32
    return %arg0, %c0_i32, %c0_i32_0 : i32, i32, i32
  }
  func.func @transform_1(%arg0: i32) -> (i32, i32) {
    %c0_i32 = arith.constant 0 : i32
    %c0_i32_0 = arith.constant 0 : i32
    %c0_i32_1 = arith.constant 0 : i32
    return %c0_i32, %c0_i32_0 : i32, i32
  }
  func.func @transform_2(%arg0: i32) -> (i32, i32) {
    %c0_i32 = arith.constant 0 : i32
    %c0_i32_0 = arith.constant 0 : i32
    %c0_i32_1 = arith.constant 0 : i32
    return %c0_i32, %c0_i32_0 : i32, i32
  }
  func.func @transform_3(%arg0: i32) -> (i32, i32) {
    %c0_i32 = arith.constant 0 : i32
    %c0_i32_0 = arith.constant 0 : i32
    %c0_i32_1 = arith.constant 0 : i32
    return %c0_i32, %c0_i32_0 : i32, i32
  }
  func.func @transform_4(%arg0: i32) -> (i32, i32) {
    %c0_i32 = arith.constant 0 : i32
    %c0_i32_0 = arith.constant 0 : i32
    %c0_i32_1 = arith.constant 0 : i32
    return %c0_i32, %c0_i32_0 : i32, i32
  }
  func.func @transform_5(%arg0: i32) -> (i32, i32) {
    %c0_i32 = arith.constant 0 : i32
    %c0_i32_0 = arith.constant 0 : i32
    %c0_i32_1 = arith.constant 0 : i32
    return %c0_i32, %c0_i32_0 : i32, i32
  }
  func.func @transform_6(%arg0: i32) -> (i32, i32) {
    %c0_i32 = arith.constant 0 : i32
    %c0_i32_0 = arith.constant 0 : i32
    %c0_i32_1 = arith.constant 0 : i32
    return %c0_i32, %c0_i32_0 : i32, i32
  }
  func.func @transform_7(%arg0: i32) -> (i32, i32, i32) {
    %c0_i32 = arith.constant 0 : i32
    %c0_i32_0 = arith.constant 0 : i32
    %c0_i32_1 = arith.constant 0 : i32
    return %arg0, %c0_i32, %c0_i32_0 : i32, i32, i32
  }
  func.func @transform_8(%arg0: i32) -> (i32, i32, i32) {
    %c0_i32 = arith.constant 0 : i32
    %c0_i32_0 = arith.constant 0 : i32
    %c0_i32_1 = arith.constant 0 : i32
    return %arg0, %c0_i32, %c0_i32_0 : i32, i32, i32
  }
  func.func @transform_9(%arg0: i32) -> (i32, i32, i32) {
    %c0_i32 = arith.constant 0 : i32
    %c0_i32_0 = arith.constant 0 : i32
    %c0_i32_1 = arith.constant 0 : i32
    return %arg0, %c0_i32, %c0_i32_0 : i32, i32, i32
  }
}

module attributes {stable_mosaic.version = 11 : i64} {
  func.func @_out_proj_kernel(%arg0: i32, %arg1: memref<1x128x256xbf16, #tpu.memory_space<vmem>>, %arg2: memref<256x256xbf16, #tpu.memory_space<vmem>>, %arg3: memref<1x256xf32, #tpu.memory_space<vmem>>, %arg4: memref<1x128x256xf32, #tpu.memory_space<vmem>>) attributes {dimension_semantics = [#tpu.dimension_semantics<parallel>], iteration_bounds = array<i64: 2>, scalar_prefetch = 0 : i64, scratch_operands = 0 : i64, tpu.core_type = #tpu.core_type<tc>, window_params = [{transform_indices = @transform_0, window_bounds = array<i64: 1, 128, 256>}, {pipeline_mode = #tpu.pipeline_mode<synchronous>, transform_indices = @transform_1, window_bounds = array<i64: 256, 256>}, {pipeline_mode = #tpu.pipeline_mode<synchronous>, transform_indices = @transform_2, window_bounds = array<i64: 1, 256>}, {transform_indices = @transform_3, window_bounds = array<i64: 1, 128, 256>}]} {
    %c0 = arith.constant 0 : index
    %c0_0 = arith.constant 0 : index
    %c0_1 = arith.constant 0 : index
    %0 = vector.load %arg1[%c0, %c0_0, %c0_1] : memref<1x128x256xbf16, #tpu.memory_space<vmem>>, vector<1x128x256xbf16>
    %1 = vector.shape_cast %0 : vector<1x128x256xbf16> to vector<128x256xbf16>
    %c0_2 = arith.constant 0 : index
    %c0_3 = arith.constant 0 : index
    %2 = vector.load %arg2[%c0_2, %c0_3] : memref<256x256xbf16, #tpu.memory_space<vmem>>, vector<256x256xbf16>
    %cst = arith.constant dense<0.000000e+00> : vector<128x256xf32>
    %3 = tpu.matmul %1, %2, %cst {dimension_numbers = #tpu.dot_dimension_numbers<[1], [0], [0], [1], [0, 0, 1, 1], [], []>} : vector<128x256xbf16>, vector<256x256xbf16>, vector<128x256xf32> -> vector<128x256xf32>
    %c0_4 = arith.constant 0 : index
    %c0_5 = arith.constant 0 : index
    %4 = vector.load %arg3[%c0_4, %c0_5] : memref<1x256xf32, #tpu.memory_space<vmem>>, vector<1x256xf32>
    %5 = vector.broadcast %4 : vector<1x256xf32> to vector<128x256xf32>
    %6 = arith.addf %3, %5 : vector<128x256xf32>
    %c0_6 = arith.constant 0 : index
    %c0_7 = arith.constant 0 : index
    %c0_8 = arith.constant 0 : index
    %7 = vector.load %arg4[%c0_6, %c0_7, %c0_8] : memref<1x128x256xf32, #tpu.memory_space<vmem>>, vector<1x128x256xf32>
    %8 = vector.shape_cast %7 : vector<1x128x256xf32> to vector<128x256xf32>
    %9 = vector.shape_cast %6 : vector<128x256xf32> to vector<1x128x256xf32>
    tpu.vector_store %arg4[%c0_6, %c0_7, %c0_8], %9 {strides = array<i32>} : memref<1x128x256xf32, #tpu.memory_space<vmem>>, vector<1x128x256xf32>,
    return
  }
  func.func @transform_0(%arg0: i32) -> (i32, i32, i32) {
    %c0_i32 = arith.constant 0 : i32
    %c0_i32_0 = arith.constant 0 : i32
    %c0_i32_1 = arith.constant 0 : i32
    return %arg0, %c0_i32, %c0_i32_0 : i32, i32, i32
  }
  func.func @transform_1(%arg0: i32) -> (i32, i32) {
    %c0_i32 = arith.constant 0 : i32
    %c0_i32_0 = arith.constant 0 : i32
    %c0_i32_1 = arith.constant 0 : i32
    return %c0_i32, %c0_i32_0 : i32, i32
  }
  func.func @transform_2(%arg0: i32) -> (i32, i32) {
    %c0_i32 = arith.constant 0 : i32
    %c0_i32_0 = arith.constant 0 : i32
    %c0_i32_1 = arith.constant 0 : i32
    return %c0_i32, %c0_i32_0 : i32, i32
  }
  func.func @transform_3(%arg0: i32) -> (i32, i32, i32) {
    %c0_i32 = arith.constant 0 : i32
    %c0_i32_0 = arith.constant 0 : i32
    %c0_i32_1 = arith.constant 0 : i32
    return %arg0, %c0_i32, %c0_i32_0 : i32, i32, i32
  }
}

</mosaic_0001>

<bundles_post_ra>
// kernel: multihead_self_attention_forward.5
= control target key start
LH: loop header
LB: loop body
LE: loop exit
PB: predicated region body
PF: predicated region fallthrough
CT: control target
= control target key end

     0   :  { %8 = vsyncpa [#allocation3], 0  ;;  %s1276_s0 = inlined_call_operand.vmem [shape: bf16[2,128,256], index: 0, kind: input, shape index: {}]   ;;  %s1277_s1 = inlined_call_operand.vmem [shape: bf16[256,256], index: 1, kind: input, shape index: {}]   ;;  %s1278_s2 = inlined_call_operand.vmem [shape: f32[1,256], index: 2, kind: input, shape index: {}]   ;;  %s1279_s3 = inlined_call_operand.hbm [shape: f32[2,128,256], index: 3, kind: output, shape index: {}]  }
   0x1   :  { %10 = vsyncpa [#allocation3 + $0x1], 0  ;;  %s982_s12 = smov 0   ;;  %s984_s13 = smov 0  }
   0x2   :  { %s986_s14 = smov 0   ;;  %s988_s15 = smov 0  }
   0x3 LB: > { %s1003_s16 = sadd.s32 4294967295, %s957_s15   ;;  %s690_s17 = sadd.s32 4294967294, %s957_s15   ;;  %s957_s15 = sphi %s988_s15, %s1285_s15   ;;  %s953_s14 = sphi %s986_s14, %s1284_s14   ;;  %s949_s13 = sphi %s984_s13, %s1283_s13   ;;  %s945_s12 = sphi %s982_s12, %s1282_s12  }
   0x4   : > { %s1007_s18 = sadd.s32 1, %s957_s15   ;;  %s91_s19 = sadd.s32 1, %s953_s14 }
   0x5   : > { %s88_s20 = ssub.s32 %s957_s15, %s1007_s18  ;;  %p101_p0 = scmp.ne.s32.totalorder %s953_s14, %s949_s13 }
   0x6   : > { %p89_p1 = scmp.eq.s32.totalorder %s88_s20, 0  ;;  %p102_p2 = scmp.eq.s32.totalorder %s1003_s16, 1 }
   0x7   : > { %p107_p3 = scmp.ne.s32.totalorder %s949_s13, %s945_s12  ;;  %p108_p4 = scmp.eq.s32.totalorder %s690_s17, 1 }
   0x8   : > { %s1018_s21 = scalar_select %p89_p1, %s953_s14, %s91_s19  }
   0x9   : > { %p1020_p5 = por %p102_p2, %p101_p0  ;;  %p1024_p6 = por %p108_p4, %p107_p3 }
   0xa   : > { %p693_p7 = scmp.ge.s32.totalorder %s957_s15, 1  ;;  %p140_p8 = scmp.lt.s32.totalorder %s957_s15, 3 }
   0xc   : > { %p141_p9 = pnand %p693_p7, %p140_p8 }
   0xd   : > { %p164_p10 = scmp.lt.s32.totalorder (!%p141_p9), %s1003_s16, 1  ;;  %s161_s20 = sand.u32 (!%p141_p9), 1, %s949_s13  }
   0xe   : > { %144 = sbr.rel (%p141_p9) target bundleno = 323 (0x143), region = 32  ;;  %s694_s26 = sshll.u32 (!%p141_p9), %s161_s20, 8 }
   0xf   : > { %s751_s27 = sshll.u32 (!%p141_p9), %s1003_s16, 12  ;;  %s959_s6 = smov (!%p141_p9), [#allocation2]  }
  0x10   : > { %s1224_s4 = scalar_lea.hbm (!%p141_p9), %s1279_s3, %s751_s27  ;;  %s901_s8 = sshll.u32 (!%p141_p9), %s959_s6, 4  ;;  %s902_s8 = int_to_ptr.vmem [resolvable:$false] %s901_s8 }
  0x11   : > { %s903_s9 = scalar_lea.vmem (!%p141_p9), %s902_s8, 8192 }
  0x13   : > { %v825_v0 = vld [vmem:[%s1277_s1 + $0x74] ss:$8 sps:$4 sm:$0xff]   ;;  %v827_v1 = vld [vmem:[%s1277_s1 + $0x70] ss:$8 sps:$4 sm:$0xff]   ;;  %v828_v2 = vld [vmem:[%s1277_s1 + $0x64] ss:$8 sps:$4 sm:$0xff]   ;;  %v219_v48 = vlaneseq }
  0x14   : > { %469 = vmatprep.subr.bf16.mxu0 %v825_v0  ;;  %752 = vmatprep.subr.bf16.mxu1 %v825_v0  ;;  %v830_v3 = vld [vmem:[%s1277_s1 + $0x60] ss:$8 sps:$4 sm:$0xff]   ;;  %v831_v4 = vld [vmem:[%s1277_s1 + $0x54] ss:$8 sps:$4 sm:$0xff]   ;;  %v833_v5 = vld [vmem:[%s1277_s1 + $0x50] ss:$8 sps:$4 sm:$0xff]  }
  0x15   : > { %470 = vmatpush1.bf16.msra.mxu0 %v827_v1  ;;  %768 = vmatpush1.bf16.msra.mxu1 %v827_v1  ;;  %v834_v6 = vld [vmem:[%s1277_s1 + $0x44] ss:$8 sps:$4 sm:$0xff]   ;;  %v836_v7 = vld [vmem:[%s1277_s1 + $0x40] ss:$8 sps:$4 sm:$0xff]   ;;  %v837_v8 = vld [vmem:[%s1277_s1 + $0x34] ss:$8 sps:$4 sm:$0xff]  }
  0x16   : > { %471 = vmatprep.subr.bf16.mxu0 %v828_v2  ;;  %753 = vmatprep.subr.bf16.mxu1 %v828_v2  ;;  %s165_s24 = scalar_select %p164_p10, %s1003_s16, 1  ;;  %v839_v9 = vld [vmem:[%s1277_s1 + $0x30] ss:$8 sps:$4 sm:$0xff]   ;;  %v840_v10 = vld [vmem:[%s1277_s1 + $0x24] ss:$8 sps:$4 sm:$0xff]   ;;  %v220_v49 = vshrl.u32 %v219_v48, 7 }
  0x17   : > { %v842_v11 = vld [vmem:[%s1277_s1 + $0x20] ss:$8 sps:$4 sm:$0xff]   ;;  %v843_v12 = vld [vmem:[%s1277_s1 + $0x14] ss:$8 sps:$4 sm:$0xff]   ;;  %v845_v14 = vld [vmem:[%s1277_s1 + $0x10] ss:$8 sps:$4 sm:$0xff]  }
  0x18   : > { %s750_s29 = sshll.u32 %s165_s24, 7  ;;  %v846_v16 = vld [vmem:[%s1277_s1 + $0x4] ss:$8 sps:$4 sm:$0xff]   ;;  %v848_v17 = vld [vmem:[%s1277_s1] ss:$8 sps:$4 sm:$0xff]   ;;  %v221_v50 = vsub.s32 0, %v220_v49 }
  0x19   : > { %472 = vmatpush1.bf16.msra.mxu0 %v830_v3  ;;  %769 = vmatpush1.bf16.msra.mxu1 %v830_v3  ;;  %s1071_s7 = scalar_lea.vmem %s1276_s0, %s750_s29  ;;  %v849_v18 = vld [vmem:[%s1277_s1 + $0xf4] ss:$8 sps:$4 sm:$0xff]   ;;  %v851_v19 = vld [vmem:[%s1277_s1 + $0xf0] ss:$8 sps:$4 sm:$0xff]   ;;  %v852_v20 = vld [vmem:[%s1277_s1 + $0xe4] ss:$8 sps:$4 sm:$0xff]  }
  0x1a   : > { %473 = vmatprep.subr.bf16.mxu0 %v831_v4  ;;  %754 = vmatprep.subr.bf16.mxu1 %v831_v4  ;;  %v875_v13 = vld [vmem:[%s1071_s7 + $0x4] ss:$8 sps:$4 sm:$0xff]   ;;  %v854_v21 = vld [vmem:[%s1277_s1 + $0xe0] ss:$8 sps:$4 sm:$0xff]   ;;  %v855_v22 = vld [vmem:[%s1277_s1 + $0xd4] ss:$8 sps:$4 sm:$0xff]  }
  0x1b   : > { %v878_v15 = vld [vmem:[%s1071_s7 + $0x44] ss:$8 sps:$4 sm:$0xff]   ;;  %501 = vmatprep.mubr.bf16.mxu0 %v875_v13  ;;  %v857_v23 = vld [vmem:[%s1277_s1 + $0xd0] ss:$8 sps:$4 sm:$0xff]   ;;  %v860_v25 = vld [vmem:[%s1277_s1 + $0xc0] ss:$8 sps:$4 sm:$0xff]  }
  0x1c   : > { %541 = vmatprep.mubr.bf16.mxu1 %v878_v15  ;;  %v858_v24 = vld [vmem:[%s1277_s1 + $0xc4] ss:$8 sps:$4 sm:$0xff]   ;;  %v861_v26 = vld [vmem:[%s1277_s1 + $0xb4] ss:$8 sps:$4 sm:$0xff]   ;;  %v863_v27 = vld [vmem:[%s1277_s1 + $0xb0] ss:$8 sps:$4 sm:$0xff]  }
  0x1d   : > { %474 = vmatpush1.bf16.msra.mxu0 %v833_v5  ;;  %770 = vmatpush1.bf16.msra.mxu1 %v833_v5  ;;  %v864_v28 = vld [vmem:[%s1277_s1 + $0xa4] ss:$8 sps:$4 sm:$0xff]   ;;  %v866_v29 = vld [vmem:[%s1277_s1 + $0xa0] ss:$8 sps:$4 sm:$0xff]   ;;  %v867_v30 = vld [vmem:[%s1277_s1 + $0x94] ss:$8 sps:$4 sm:$0xff]  }
  0x1e   : > { %475 = vmatprep.subr.bf16.mxu0 %v834_v6  ;;  %755 = vmatprep.subr.bf16.mxu1 %v834_v6  ;;  %v869_v31 = vld [vmem:[%s1277_s1 + $0x90] ss:$8 sps:$4 sm:$0xff]   ;;  %v870_v32 = vld [vmem:[%s1277_s1 + $0x84] ss:$8 sps:$4 sm:$0xff]   ;;  %v872_v33 = vld [vmem:[%s1277_s1 + $0x80] ss:$8 sps:$4 sm:$0xff]  }
  0x1f   : > { %v873_v34 = vld [vmem:[%s1071_s7] ss:$8 sps:$4 sm:$0xff]   ;;  %v879_v36 = vld [vmem:[%s1071_s7 + $0x14] ss:$8 sps:$4 sm:$0xff]   ;;  %v883_v38 = vld [vmem:[%s1071_s7 + $0x10] ss:$8 sps:$4 sm:$0xff]  }
  0x20   : > { %v876_v35 = vld [vmem:[%s1071_s7 + $0x40] ss:$8 sps:$4 sm:$0xff]   ;;  %v881_v37 = vld [vmem:[%s1071_s7 + $0x54] ss:$8 sps:$4 sm:$0xff]   ;;  %v884_v39 = vld [vmem:[%s1071_s7 + $0x50] ss:$8 sps:$4 sm:$0xff]  }
  0x21   : > { %476 = vmatpush1.bf16.msra.mxu0 %v836_v7  ;;  %771 = vmatpush1.bf16.msra.mxu1 %v836_v7  ;;  %v885_v40 = vld [vmem:[%s1071_s7 + $0x24] ss:$8 sps:$4 sm:$0xff]   ;;  %v889_v42 = vld [vmem:[%s1071_s7 + $0x20] ss:$8 sps:$4 sm:$0xff]   ;;  %v891_v44 = vld [vmem:[%s1071_s7 + $0x34] ss:$8 sps:$4 sm:$0xff]  }
  0x22   : > { %477 = vmatprep.subr.bf16.mxu0 %v837_v8  ;;  %756 = vmatprep.subr.bf16.mxu1 %v837_v8  ;;  %v887_v41 = vld [vmem:[%s1071_s7 + $0x64] ss:$8 sps:$4 sm:$0xff]   ;;  %v890_v43 = vld [vmem:[%s1071_s7 + $0x60] ss:$8 sps:$4 sm:$0xff]   ;;  %v893_v45 = vld [vmem:[%s1071_s7 + $0x74] ss:$8 sps:$4 sm:$0xff]  }
  0x23   : > { %v895_v46 = vld [vmem:[%s1071_s7 + $0x30] ss:$8 sps:$4 sm:$0xff]   ;;  %v217_v51 = vld [vmem:[%s1278_s2] sm:$0x3]  ;;  %v225_v52 = vsub.s32 1, %v220_v49  ;;  %s1236_s16 = scalar_lea.sflag [#allocation3], %s161_s20 }
  0x24   : > { %v896_v47 = vld [vmem:[%s1071_s7 + $0x70] ss:$8 sps:$4 sm:$0xff]   ;;  %v1155_v53 = vrot.slane %v217_v51, %v221_v50  ;;  %s1161_s7 = scalar_lea.vmem [#allocation2], %s694_s26 }
  0x25   : > { %478 = vmatpush1.bf16.msra.mxu0 %v839_v9  ;;  %772 = vmatpush1.bf16.msra.mxu1 %v839_v9  ;;  %v1157_v54 = vrot.slane %v217_v51, %v225_v52  ;;  %s628_s28 = sshll.u32 %s1161_s7, 4  ;;  %s1226_s28 = int_to_ptr.vmem [resolvable:$true] %s628_s28 }
  0x26   : > { %479 = vmatprep.subr.bf16.mxu0 %v840_v10  ;;  %757 = vmatprep.subr.bf16.mxu1 %v840_v10  ;;  %s897_s5 = scalar_lea.vmem %s1226_s28, 4096  ;;  %p904_p0 = scmp.lt.s32.totalorder %s1226_s28, %s902_s8 }
  0x27   : > { %p898_p11 = scmp.ne.s32.totalorder %s1226_s28, %s897_s5  ;;  %p905_p1 = scmp.lt.s32.totalorder %s903_s9, %s897_s5 }
  0x29   : > { %480 = vmatpush1.bf16.msra.mxu0 %v842_v11  ;;  %773 = vmatpush1.bf16.msra.mxu1 %v842_v11  ;;  %p899_p12 = pnand %p898_p11, %p1020_p5  ;;  %p906_p2 = por %p905_p1, %p904_p0 }
  0x2a   : > { %481 = vmatprep.subr.bf16.mxu0 %v843_v12  ;;  %758 = vmatprep.subr.bf16.mxu1 %v843_v12 }
  0x2b   : > { %p900_p13 = pneg %p899_p12 }
  0x2d   : > { %482 = vmatpush1.bf16.msra.mxu0 %v845_v14  ;;  %774 = vmatpush1.bf16.msra.mxu1 %v845_v14  ;;  %p907_p3 = pnand %p906_p2, %p900_p13 }
  0x2e   : > { %483 = vmatprep.subr.bf16.mxu0 %v846_v16  ;;  %759 = vmatprep.subr.bf16.mxu1 %v846_v16 }
  0x31   : > { %484 = vmatpush1.bf16.msra.mxu0 %v848_v17  ;;  %775 = vmatpush1.bf16.msra.mxu1 %v848_v17 }
  0x32   : > { %485 = vmatprep.subr.bf16.mxu0 %v849_v18  ;;  %760 = vmatprep.subr.bf16.mxu1 %v849_v18 }
  0x35   : > { %486 = vmatpush2.bf16.msra.mxu0 %v851_v19  ;;  %776 = vmatpush2.bf16.msra.mxu1 %v851_v19 }
  0x36   : > { %487 = vmatprep.subr.bf16.mxu0 %v852_v20  ;;  %761 = vmatprep.subr.bf16.mxu1 %v852_v20 }
  0x39   : > { %488 = vmatpush2.bf16.msra.mxu0 %v854_v21  ;;  %777 = vmatpush2.bf16.msra.mxu1 %v854_v21 }
  0x3a   : > { %489 = vmatprep.subr.bf16.mxu0 %v855_v22  ;;  %762 = vmatprep.subr.bf16.mxu1 %v855_v22 }
  0x3d   : > { %490 = vmatpush2.bf16.msra.mxu0 %v857_v23  ;;  %778 = vmatpush2.bf16.msra.mxu1 %v857_v23 }
  0x3e   : > { %491 = vmatprep.subr.bf16.mxu0 %v858_v24  ;;  %763 = vmatprep.subr.bf16.mxu1 %v858_v24 }
  0x41   : > { %492 = vmatpush2.bf16.msra.mxu0 %v860_v25  ;;  %779 = vmatpush2.bf16.msra.mxu1 %v860_v25 }
  0x42   : > { %493 = vmatprep.subr.bf16.mxu0 %v861_v26  ;;  %764 = vmatprep.subr.bf16.mxu1 %v861_v26 }
  0x45   : > { %494 = vmatpush2.bf16.msra.mxu0 %v863_v27  ;;  %780 = vmatpush2.bf16.msra.mxu1 %v863_v27 }
  0x46   : > { %495 = vmatprep.subr.bf16.mxu0 %v864_v28  ;;  %765 = vmatprep.subr.bf16.mxu1 %v864_v28 }
  0x49   : > { %496 = vmatpush2.bf16.msra.mxu0 %v866_v29  ;;  %781 = vmatpush2.bf16.msra.mxu1 %v866_v29 }
  0x4a   : > { %497 = vmatprep.subr.bf16.mxu0 %v867_v30  ;;  %766 = vmatprep.subr.bf16.mxu1 %v867_v30 }
  0x4d   : > { %498 = vmatpush2.bf16.msra.mxu0 %v869_v31  ;;  %782 = vmatpush2.bf16.msra.mxu1 %v869_v31 }
  0x4e   : > { %499 = vmatprep.subr.bf16.mxu0 %v870_v32  ;;  %767 = vmatprep.subr.bf16.mxu1 %v870_v32 }
  0x51   : > { %500 = vmatpush2.bf16.msra.mxu0 %v872_v33  ;;  %783 = vmatpush2.bf16.msra.mxu1 %v872_v33 }
  0x54   : > { %502 = vmatmul.mubr.bf16.vlgmr.msra.gmra.mxu0 %v873_v34  ;;  %542 = vmatmul.mubr.bf16.vlgmr.msra.gmra.mxu1 %v876_v35 }
  0x55   : > { %511 = vmatprep.mubr.bf16.mxu0 %v879_v36  ;;  %551 = vmatprep.mubr.bf16.mxu1 %v881_v37 }
  0x5c   : > { %512 = vmatmul.mubr.bf16.gmra.mxu0 %v883_v38  ;;  %552 = vmatmul.mubr.bf16.gmra.mxu1 %v884_v39 }
  0x5d   : > { %521 = vmatprep.mubr.bf16.mxu0 %v885_v40  ;;  %561 = vmatprep.mubr.bf16.mxu1 %v887_v41 }
  0x64   : > { %522 = vmatmul.mubr.bf16.gmra.mxu0 %v889_v42  ;;  %562 = vmatmul.mubr.bf16.gmra.mxu1 %v890_v43 }
  0x65   : > { %531 = vmatprep.mubr.bf16.mxu0 %v891_v44  ;;  %571 = vmatprep.mubr.bf16.mxu1 %v893_v45 }
  0x6c   : > { %532 = vmatmul.mubr.bf16.gmra.mxu0 %v895_v46  ;;  %572 = vmatmul.mubr.bf16.gmra.mxu1 %v896_v47 }
 0x114   : > { %v503_v55 = vpop.f32.mrf.mxu0  ;;  %v543_v56 = vpop.f32.mrf.mxu1 }
 0x115   : > { %v504_v57 = vadd.f32 %v503_v55, %v1155_v53  ;;  %v544_v58 = vadd.f32 %v543_v56, %v1155_v53 }
 0x116   : > { %v505_v59 = vpop.f32.mrf.mxu0  ;;  %v545_v60 = vpop.f32.mrf.mxu1 }
 0x117   : > { %582 = vst [vmem:[%s1161_s7] sm:$0xff] %v504_v57  ;;  %598 = vst [vmem:[%s1161_s7 + $0x80] sm:$0xff] %v544_v58  ;;  %v506_v61 = vadd.f32 %v505_v59, %v1157_v54  ;;  %v546_v62 = vadd.f32 %v545_v60, %v1157_v54 }
 0x118   : > { %v507_v63 = vpop.f32.mrf.mxu0  ;;  %v547_v0 = vpop.f32.mrf.mxu1 }
 0x119   : > { %583 = vst [vmem:[%s1161_s7 + $0x8] sm:$0xff] %v506_v61  ;;  %599 = vst [vmem:[%s1161_s7 + $0x88] sm:$0xff] %v546_v62  ;;  %v508_v1 = vadd.f32 %v507_v63, %v1155_v53  ;;  %v548_v2 = vadd.f32 %v547_v0, %v1155_v53 }
 0x11a   : > { %v509_v3 = vpop.f32.mrf.mxu0  ;;  %v549_v4 = vpop.f32.mrf.mxu1 }
 0x11b   : > { %584 = vst [vmem:[%s1161_s7 + $0x10] sm:$0xff] %v508_v1  ;;  %600 = vst [vmem:[%s1161_s7 + $0x90] sm:$0xff] %v548_v2  ;;  %v510_v5 = vadd.f32 %v509_v3, %v1157_v54  ;;  %v550_v6 = vadd.f32 %v549_v4, %v1157_v54 }
 0x11c   : > { %v513_v7 = vpop.f32.mrf.mxu0  ;;  %v553_v8 = vpop.f32.mrf.mxu1 }
 0x11d   : > { %585 = vst [vmem:[%s1161_s7 + $0x18] sm:$0xff] %v510_v5  ;;  %601 = vst [vmem:[%s1161_s7 + $0x98] sm:$0xff] %v550_v6  ;;  %v514_v9 = vadd.f32 %v513_v7, %v1155_v53  ;;  %v554_v10 = vadd.f32 %v553_v8, %v1155_v53 }
 0x11e   : > { %v515_v11 = vpop.f32.mrf.mxu0  ;;  %v555_v12 = vpop.f32.mrf.mxu1 }
 0x11f   : > { %586 = vst [vmem:[%s1161_s7 + $0x20] sm:$0xff] %v514_v9  ;;  %602 = vst [vmem:[%s1161_s7 + $0xa0] sm:$0xff] %v554_v10  ;;  %v516_v13 = vadd.f32 %v515_v11, %v1157_v54  ;;  %v556_v14 = vadd.f32 %v555_v12, %v1157_v54 }
 0x120   : > { %v517_v15 = vpop.f32.mrf.mxu0  ;;  %v557_v16 = vpop.f32.mrf.mxu1 }
 0x121   : > { %587 = vst [vmem:[%s1161_s7 + $0x28] sm:$0xff] %v516_v13  ;;  %603 = vst [vmem:[%s1161_s7 + $0xa8] sm:$0xff] %v556_v14  ;;  %v518_v17 = vadd.f32 %v517_v15, %v1155_v53  ;;  %v558_v18 = vadd.f32 %v557_v16, %v1155_v53 }
 0x122   : > { %v519_v19 = vpop.f32.mrf.mxu0  ;;  %v559_v20 = vpop.f32.mrf.mxu1 }
 0x123   : > { %588 = vst [vmem:[%s1161_s7 + $0x30] sm:$0xff] %v518_v17  ;;  %604 = vst [vmem:[%s1161_s7 + $0xb0] sm:$0xff] %v558_v18  ;;  %v520_v21 = vadd.f32 %v519_v19, %v1157_v54  ;;  %v560_v22 = vadd.f32 %v559_v20, %v1157_v54 }
 0x124   : > { %v523_v23 = vpop.f32.mrf.mxu0  ;;  %v563_v24 = vpop.f32.mrf.mxu1 }
 0x125   : > { %589 = vst [vmem:[%s1161_s7 + $0x38] sm:$0xff] %v520_v21  ;;  %605 = vst [vmem:[%s1161_s7 + $0xb8] sm:$0xff] %v560_v22  ;;  %v524_v25 = vadd.f32 %v523_v23, %v1155_v53  ;;  %v564_v26 = vadd.f32 %v563_v24, %v1155_v53 }
 0x126   : > { %v525_v27 = vpop.f32.mrf.mxu0  ;;  %v565_v28 = vpop.f32.mrf.mxu1 }
 0x127   : > { %590 = vst [vmem:[%s1161_s7 + $0x40] sm:$0xff] %v524_v25  ;;  %606 = vst [vmem:[%s1161_s7 + $0xc0] sm:$0xff] %v564_v26  ;;  %v526_v29 = vadd.f32 %v525_v27, %v1157_v54  ;;  %v566_v30 = vadd.f32 %v565_v28, %v1157_v54 }
 0x128   : > { %v527_v31 = vpop.f32.mrf.mxu0  ;;  %v567_v32 = vpop.f32.mrf.mxu1 }
 0x129   : > { %591 = vst [vmem:[%s1161_s7 + $0x48] sm:$0xff] %v526_v29  ;;  %607 = vst [vmem:[%s1161_s7 + $0xc8] sm:$0xff] %v566_v30  ;;  %v528_v33 = vadd.f32 %v527_v31, %v1155_v53  ;;  %v568_v34 = vadd.f32 %v567_v32, %v1155_v53 }
 0x12a   : > { %v529_v35 = vpop.f32.mrf.mxu0  ;;  %v569_v36 = vpop.f32.mrf.mxu1 }
 0x12b   : > { %592 = vst [vmem:[%s1161_s7 + $0x50] sm:$0xff] %v528_v33  ;;  %608 = vst [vmem:[%s1161_s7 + $0xd0] sm:$0xff] %v568_v34  ;;  %v530_v37 = vadd.f32 %v529_v35, %v1157_v54  ;;  %v570_v38 = vadd.f32 %v569_v36, %v1157_v54 }
 0x12c   : > { %v533_v39 = vpop.f32.mrf.mxu0  ;;  %v573_v40 = vpop.f32.mrf.mxu1 }
 0x12d   : > { %593 = vst [vmem:[%s1161_s7 + $0x58] sm:$0xff] %v530_v37  ;;  %609 = vst [vmem:[%s1161_s7 + $0xd8] sm:$0xff] %v570_v38  ;;  %v534_v41 = vadd.f32 %v533_v39, %v1155_v53  ;;  %v574_v42 = vadd.f32 %v573_v40, %v1155_v53 }
 0x12e   : > { %v535_v43 = vpop.f32.mrf.mxu0  ;;  %v575_v44 = vpop.f32.mrf.mxu1 }
 0x12f   : > { %594 = vst [vmem:[%s1161_s7 + $0x60] sm:$0xff] %v534_v41  ;;  %610 = vst [vmem:[%s1161_s7 + $0xe0] sm:$0xff] %v574_v42  ;;  %v536_v45 = vadd.f32 %v535_v43, %v1157_v54  ;;  %v576_v46 = vadd.f32 %v575_v44, %v1157_v54 }
 0x130   : > { %v537_v47 = vpop.f32.mrf.mxu0  ;;  %v577_v48 = vpop.f32.mrf.mxu1 }
 0x131   : > { %595 = vst [vmem:[%s1161_s7 + $0x68] sm:$0xff] %v536_v45  ;;  %611 = vst [vmem:[%s1161_s7 + $0xe8] sm:$0xff] %v576_v46  ;;  %v538_v49 = vadd.f32 %v537_v47, %v1155_v53  ;;  %v578_v50 = vadd.f32 %v577_v48, %v1155_v53 }
 0x132   : > { %v539_v51 = vpop.f32.mrf.mxu0  ;;  %v579_v52 = vpop.f32.mrf.mxu1 }
 0x133   : > { %596 = vst [vmem:[%s1161_s7 + $0x70] sm:$0xff] %v538_v49  ;;  %612 = vst [vmem:[%s1161_s7 + $0xf0] sm:$0xff] %v578_v50  ;;  %v540_v55 = vadd.f32 %v539_v51, %v1157_v54  ;;  %v580_v56 = vadd.f32 %v579_v52, %v1157_v54 }
 0x135   : > { %597 = vst [vmem:[%s1161_s7 + $0x78] sm:$0xff] %v540_v55  ;;  %613 = vst [vmem:[%s1161_s7 + $0xf8] sm:$0xff] %v580_v56 }
 0x136   : > { %910 = shalt.err (!%p907_p3)
}
 0x137   : > { %s911_s10 = scalar_lea.hbm %s1224_s4, 4096  ;;  %s915_s19 = scalar_lea.hbm %s1279_s3, 8192 }
 0x138   : > { %p912_p4 = scmp.ne.s32.totalorder %s1224_s4, %s911_s10  ;;  %p916_p9 = scmp.lt.s32.totalorder %s1224_s4, %s1279_s3 }
 0x139   : > { %p917_p10 = scmp.lt.s32.totalorder %s915_s19, %s911_s10 }
 0x13a   : > { %p913_p7 = pnand %p912_p4, %p1020_p5 }
 0x13b   : > { %p918_p11 = por %p917_p10, %p916_p9 }
 0x13c   : > { %p914_p8 = pneg %p913_p7 }
 0x13e   : > { %p919_p12 = pnand %p918_p11, %p914_p8 }
 0x140   : > { %922 = shalt.err (!%p919_p12)
}
 0x141   : > { %s960_s25 = smov 256   ;;  %s961_s26 = smov 16  }
 0x142   : > { %784 = dma.vmem_to_hbm [thread:$0]  (%p1020_p5), %s1226_s28, 4096, %s1224_s4, %s1236_s16, %s960_s25, %s960_s25, %s961_s26  }
 0x143 PF: > { %p790_p13 = scmp.ge.s32.totalorder %s957_s15, 2  ;;  %s643_s7 = sand.u32 1, %s945_s12  }
 0x144   : > { %s644_s27 = scalar_lea.sflag [#allocation3], %s643_s7 }
 0x145   : > { %p787_p0 = pnand %p790_p13, %p1024_p6 }
 0x147   : > { %p788_p1 = pneg %p787_p0 }
 0x149   : > { %940 = dma.done.wait (%p788_p1), %s644_s27, 4096  }
 0x14a   : > { %942 = vsyncadd (%p788_p1), %s644_s27, 4294963200  ;;  %p13_p2 = scmp.ge.s32.totalorder %s1007_s18, 4   ;;  %s1282_s12 = smov %s949_s13 }
 0x14b   : > { %s1283_s13 = smov %s953_s14  ;;  %s1284_s14 = smov %s1018_s21 }
 0x14c   : > { %s1285_s15 = smov %s1007_s18  ;;  %15 = sbr.rel (!%p13_p2) target bundleno = 3 (0x3), region = 67 }
 0x151   :  { %649 = vsyncpa [#allocation3], 1 }
 0x152   :  { %651 = vsyncpa [#allocation3 + $0x1], 1 }

// kernel: multihead_self_attention_forward.4
= control target key start
LH: loop header
LB: loop body
LE: loop exit
PB: predicated region body
PF: predicated region fallthrough
CT: control target
= control target key end

     0   :  { %s2448_s0 = inlined_call_operand.vmem [shape: bf16[2,128,256], index: 0, kind: input, shape index: {}]   ;;  %s2449_s1 = inlined_call_operand.vmem [shape: bf16[2,128,256], index: 1, kind: input, shape index: {}]   ;;  %s2450_s2 = inlined_call_operand.vmem [shape: bf16[2,128,256], index: 2, kind: input, shape index: {}]   ;;  %s2451_s3 = inlined_call_operand.hbm [shape: f32[2,2,128,128], index: 3, kind: output, shape index: {0}]   ;;  %s2452_s4 = inlined_call_operand.vmem [shape: bf16[2,128,256], index: 4, kind: output, shape index: {1}]  }
   0x1   :  { %2454 = sst [smem:[#allocation9_spill]] %s2448_s0 }
   0x2   :  { %10 = vsyncpa [#allocation6], 0 }
   0x3   :  { %12 = vsyncpa [#allocation6 + $0x1], 0  ;;  %s2055_s15 = smov 0   ;;  %s2057_s16 = smov 0  }
   0x4   :  { %s2059_s17 = smov 0   ;;  %s2061_s18 = smov 0  }
   0x5   :  { %s2063_s19 = smov 0   ;;  %s2065_s20 = smov 0  }
   0x6   :  { %s2067_s21 = smov 0   ;;  %s2069_s22 = smov 0  }
   0x7 LB: > { %s1522_s23 = sadd.s32 4294967295, %s2025_s22   ;;  %s1523_s24 = sadd.s32 4294967294, %s2025_s22   ;;  %s2025_s22 = sphi %s2069_s22, %s18_s22   ;;  %s2021_s21 = sphi %s2067_s21, %s2466_s21   ;;  %s2017_s20 = sphi %s2065_s20, %s2465_s20   ;;  %s2013_s19 = sphi %s2063_s19, %s2464_s19   ;;  %s2009_s18 = sphi %s2061_s18, %s2463_s18   ;;  %s2005_s17 = sphi %s2059_s17, %s2462_s17   ;;  %s2001_s16 = sphi %s2057_s16, %s2461_s16   ;;  %s1997_s15 = sphi %s2055_s15, %s2460_s15  }
   0x8   : > { %s33_s25 = sadd.s32 1, %s2017_s20  ;;  %s37_s26 = sadd.s32 1, %s2021_s21 }
   0x9   : > { %p35_p0 = scmp.ge.s32.totalorder %s33_s25, 2  ;;  %p55_p1 = scmp.ne.s32.totalorder %s2005_s17, %s2001_s16 }
   0xa   : > { %p56_p2 = scmp.eq.s32.totalorder %s2025_s22, 0  ;;  %p145_p5 = scmp.eq.s32.totalorder %s1522_s23, 3 }
   0xb   : > { %s2468_s25 = smov (%p35_p0, %s33_s25), 0  ;;  %s2470_s26 = smov (!%p35_p0, %s37_s26), %s2021_s21 }
   0xc   : > { %s44_s27 = ssub.s32 %s2017_s20, %s2468_s25  ;;  %p2107_p3 = por %p56_p2, %p55_p1 }
   0xd   : > { %p39_p4 = scmp.ge.s32.totalorder %s2470_s26, 2  ;;  %p150_p6 = scmp.ne.s32.totalorder %s2001_s16, %s1997_s15 }
   0xe   : > { %p151_p7 = scmp.eq.s32.totalorder %s1523_s24, 3  ;;  %p2115_p8 = por %p145_p5, %p55_p1 }
   0xf   : > { %s2472_s26 = smov (%p39_p4, %s2470_s26), 0  ;;  %s48_s7 = sadd.s32 1, %s2005_s17 }
  0x10   : > { %p2119_p9 = por %p151_p7, %p150_p6  ;;  %s41_s5 = ssub.s32 %s2021_s21, %s2472_s26 }
  0x11   : > { %s45_s6 = sor.u32 %s44_s27, %s41_s5  ;;  %p1525_p11 = scmp.ge.s32.totalorder %s2025_s22, 4 }
  0x12   : > { %p46_p10 = scmp.eq.s32.totalorder %s45_s6, 0 }
  0x13   : > { %197 = sbr.rel (%p1525_p11) target bundleno = 76 (0x4c), region = 16 }
  0x14   : > { %s2127_s8 = scalar_select %p46_p10, %s2005_s17, %s48_s7  }
  0x18   : > { %200 = sbr.rel (!%p2107_p3) target bundleno = 44 (0x2c), region = 20  ;;  %s202_s9 = sand.u32 (%p2107_p3), 1, %s2005_s17  }
  0x19   : > { %s1527_s10 = sshll.u32 (%p2107_p3), %s2021_s21, 5  ;;  %s1526_s11 = sshll.u32 (%p2107_p3), %s202_s9, 6 }
  0x1a   : > { %s209_s12 = sadd.s32 (%p2107_p3), %s2017_s20, %s1527_s10  ;;  %s2458_s0 = sld [smem:[#allocation9_spill]] (%p2107_p3) }
  0x1b   : > { %s1528_s13 = sshll.u32 (%p2107_p3), %s209_s12, 2  ;;  %s204_s27 = scalar_lea.vmem (%p2107_p3), [#allocation2], %s1526_s11 }
  0x20   : > { %s2138_s24 = scalar_lea.vmem %s2458_s0, %s1528_s13 }
  0x21   : > { %v228_v0 = vld [vmem:[%s2138_s24] sm:$0xf]  ;;  %v230_v1 = vld [vmem:[%s2138_s24 + $0x8] sm:$0xf]  ;;  %v232_v2 = vld [vmem:[%s2138_s24 + $0x10] sm:$0xf] }
  0x22   : > { %229 = vst [vmem:[%s204_s27] sm:$0xf] %v228_v0  ;;  %231 = vst [vmem:[%s204_s27 + $0x4] sm:$0xf] %v230_v1  ;;  %v234_v3 = vld [vmem:[%s2138_s24 + $0x18] sm:$0xf] }
  0x23   : > { %233 = vst [vmem:[%s204_s27 + $0x8] sm:$0xf] %v232_v2  ;;  %v236_v4 = vld [vmem:[%s2138_s24 + $0x20] sm:$0xf]  ;;  %v238_v5 = vld [vmem:[%s2138_s24 + $0x28] sm:$0xf] }
  0x24   : > { %235 = vst [vmem:[%s204_s27 + $0xc] sm:$0xf] %v234_v3  ;;  %237 = vst [vmem:[%s204_s27 + $0x10] sm:$0xf] %v236_v4  ;;  %v240_v6 = vld [vmem:[%s2138_s24 + $0x30] sm:$0xf] }
  0x25   : > { %239 = vst [vmem:[%s204_s27 + $0x14] sm:$0xf] %v238_v5  ;;  %v242_v7 = vld [vmem:[%s2138_s24 + $0x38] sm:$0xf]  ;;  %v244_v8 = vld [vmem:[%s2138_s24 + $0x40] sm:$0xf] }
  0x26   : > { %241 = vst [vmem:[%s204_s27 + $0x18] sm:$0xf] %v240_v6  ;;  %243 = vst [vmem:[%s204_s27 + $0x1c] sm:$0xf] %v242_v7  ;;  %v246_v9 = vld [vmem:[%s2138_s24 + $0x48] sm:$0xf] }
  0x27   : > { %245 = vst [vmem:[%s204_s27 + $0x20] sm:$0xf] %v244_v8  ;;  %v248_v10 = vld [vmem:[%s2138_s24 + $0x50] sm:$0xf]  ;;  %v250_v11 = vld [vmem:[%s2138_s24 + $0x58] sm:$0xf] }
  0x28   : > { %247 = vst [vmem:[%s204_s27 + $0x24] sm:$0xf] %v246_v9  ;;  %249 = vst [vmem:[%s204_s27 + $0x28] sm:$0xf] %v248_v10  ;;  %v252_v12 = vld [vmem:[%s2138_s24 + $0x60] sm:$0xf] }
  0x29   : > { %251 = vst [vmem:[%s204_s27 + $0x2c] sm:$0xf] %v250_v11  ;;  %v254_v13 = vld [vmem:[%s2138_s24 + $0x68] sm:$0xf]  ;;  %v256_v14 = vld [vmem:[%s2138_s24 + $0x70] sm:$0xf] }
  0x2a   : > { %253 = vst [vmem:[%s204_s27 + $0x30] sm:$0xf] %v252_v12  ;;  %255 = vst [vmem:[%s204_s27 + $0x34] sm:$0xf] %v254_v13  ;;  %v258_v15 = vld [vmem:[%s2138_s24 + $0x78] sm:$0xf] }
  0x2b   : > { %257 = vst [vmem:[%s204_s27 + $0x38] sm:$0xf] %v256_v14  ;;  %259 = vst [vmem:[%s204_s27 + $0x3c] sm:$0xf] %v258_v15 }
  0x2c PF: > { %315 = sbr.rel (!%p2107_p3) target bundleno = 60 (0x3c), region = 61  ;;  %s317_s5 = sand.u32 (%p2107_p3), 1, %s2005_s17  }
  0x2d   : > { %s1530_s6 = sshll.u32 (%p2107_p3), %s2021_s21, 5  ;;  %s1529_s7 = sshll.u32 (%p2107_p3), %s317_s5, 6 }
  0x2e   : > { %s321_s9 = sadd.s32 (%p2107_p3), %s2017_s20, %s1530_s6  ;;  %s319_s14 = scalar_lea.vmem (%p2107_p3), [#allocation3], %s1529_s7 }
  0x2f   : > { %s1531_s10 = sshll.u32 (%p2107_p3), %s321_s9, 2 }
  0x30   : > { %s2164_s13 = scalar_lea.vmem (%p2107_p3), %s2449_s1, %s1531_s10 }
  0x31   : > { %v340_v16 = vld [vmem:[%s2164_s13] sm:$0xf]  ;;  %v342_v17 = vld [vmem:[%s2164_s13 + $0x8] sm:$0xf]  ;;  %v344_v18 = vld [vmem:[%s2164_s13 + $0x10] sm:$0xf] }
  0x32   : > { %341 = vst [vmem:[%s319_s14] sm:$0xf] %v340_v16  ;;  %343 = vst [vmem:[%s319_s14 + $0x4] sm:$0xf] %v342_v17  ;;  %v346_v19 = vld [vmem:[%s2164_s13 + $0x18] sm:$0xf] }
  0x33   : > { %345 = vst [vmem:[%s319_s14 + $0x8] sm:$0xf] %v344_v18  ;;  %v348_v20 = vld [vmem:[%s2164_s13 + $0x20] sm:$0xf]  ;;  %v350_v21 = vld [vmem:[%s2164_s13 + $0x28] sm:$0xf] }
  0x34   : > { %347 = vst [vmem:[%s319_s14 + $0xc] sm:$0xf] %v346_v19  ;;  %349 = vst [vmem:[%s319_s14 + $0x10] sm:$0xf] %v348_v20  ;;  %v352_v22 = vld [vmem:[%s2164_s13 + $0x30] sm:$0xf] }
  0x35   : > { %351 = vst [vmem:[%s319_s14 + $0x14] sm:$0xf] %v350_v21  ;;  %v354_v23 = vld [vmem:[%s2164_s13 + $0x38] sm:$0xf]  ;;  %v356_v24 = vld [vmem:[%s2164_s13 + $0x40] sm:$0xf] }
  0x36   : > { %353 = vst [vmem:[%s319_s14 + $0x18] sm:$0xf] %v352_v22  ;;  %355 = vst [vmem:[%s319_s14 + $0x1c] sm:$0xf] %v354_v23  ;;  %v358_v25 = vld [vmem:[%s2164_s13 + $0x48] sm:$0xf] }
  0x37   : > { %357 = vst [vmem:[%s319_s14 + $0x20] sm:$0xf] %v356_v24  ;;  %v360_v26 = vld [vmem:[%s2164_s13 + $0x50] sm:$0xf]  ;;  %v362_v27 = vld [vmem:[%s2164_s13 + $0x58] sm:$0xf] }
  0x38   : > { %359 = vst [vmem:[%s319_s14 + $0x24] sm:$0xf] %v358_v25  ;;  %361 = vst [vmem:[%s319_s14 + $0x28] sm:$0xf] %v360_v26  ;;  %v364_v28 = vld [vmem:[%s2164_s13 + $0x60] sm:$0xf] }
  0x39   : > { %363 = vst [vmem:[%s319_s14 + $0x2c] sm:$0xf] %v362_v27  ;;  %v366_v29 = vld [vmem:[%s2164_s13 + $0x68] sm:$0xf]  ;;  %v368_v30 = vld [vmem:[%s2164_s13 + $0x70] sm:$0xf] }
  0x3a   : > { %365 = vst [vmem:[%s319_s14 + $0x30] sm:$0xf] %v364_v28  ;;  %367 = vst [vmem:[%s319_s14 + $0x34] sm:$0xf] %v366_v29  ;;  %v370_v31 = vld [vmem:[%s2164_s13 + $0x78] sm:$0xf] }
  0x3b   : > { %369 = vst [vmem:[%s319_s14 + $0x38] sm:$0xf] %v368_v30  ;;  %371 = vst [vmem:[%s319_s14 + $0x3c] sm:$0xf] %v370_v31 }
  0x3c PF: > { %427 = sbr.rel (!%p2107_p3) target bundleno = 76 (0x4c), region = 102  ;;  %s429_s23 = sand.u32 (%p2107_p3), 1, %s2005_s17  }
  0x3d   : > { %s1533_s24 = sshll.u32 (%p2107_p3), %s2021_s21, 5  ;;  %s1532_s27 = sshll.u32 (%p2107_p3), %s429_s23, 6 }
  0x3e   : > { %s433_s5 = sadd.s32 (%p2107_p3), %s2017_s20, %s1533_s24  ;;  %s431_s28 = scalar_lea.vmem (%p2107_p3), [#allocation4], %s1532_s27 }
  0x3f   : > { %s1534_s6 = sshll.u32 (%p2107_p3), %s433_s5, 2 }
  0x40   : > { %s2190_s10 = scalar_lea.vmem (%p2107_p3), %s2450_s2, %s1534_s6 }
  0x41   : > { %v452_v32 = vld [vmem:[%s2190_s10] sm:$0xf]  ;;  %v454_v33 = vld [vmem:[%s2190_s10 + $0x8] sm:$0xf]  ;;  %v456_v34 = vld [vmem:[%s2190_s10 + $0x10] sm:$0xf] }
  0x42   : > { %453 = vst [vmem:[%s431_s28] sm:$0xf] %v452_v32  ;;  %455 = vst [vmem:[%s431_s28 + $0x4] sm:$0xf] %v454_v33  ;;  %v458_v35 = vld [vmem:[%s2190_s10 + $0x18] sm:$0xf] }
  0x43   : > { %457 = vst [vmem:[%s431_s28 + $0x8] sm:$0xf] %v456_v34  ;;  %v460_v36 = vld [vmem:[%s2190_s10 + $0x20] sm:$0xf]  ;;  %v462_v37 = vld [vmem:[%s2190_s10 + $0x28] sm:$0xf] }
  0x44   : > { %459 = vst [vmem:[%s431_s28 + $0xc] sm:$0xf] %v458_v35  ;;  %461 = vst [vmem:[%s431_s28 + $0x10] sm:$0xf] %v460_v36  ;;  %v464_v38 = vld [vmem:[%s2190_s10 + $0x30] sm:$0xf] }
  0x45   : > { %463 = vst [vmem:[%s431_s28 + $0x14] sm:$0xf] %v462_v37  ;;  %v466_v39 = vld [vmem:[%s2190_s10 + $0x38] sm:$0xf]  ;;  %v468_v40 = vld [vmem:[%s2190_s10 + $0x40] sm:$0xf] }
  0x46   : > { %465 = vst [vmem:[%s431_s28 + $0x18] sm:$0xf] %v464_v38  ;;  %467 = vst [vmem:[%s431_s28 + $0x1c] sm:$0xf] %v466_v39  ;;  %v470_v41 = vld [vmem:[%s2190_s10 + $0x48] sm:$0xf] }
  0x47   : > { %469 = vst [vmem:[%s431_s28 + $0x20] sm:$0xf] %v468_v40  ;;  %v472_v42 = vld [vmem:[%s2190_s10 + $0x50] sm:$0xf]  ;;  %v474_v43 = vld [vmem:[%s2190_s10 + $0x58] sm:$0xf] }
  0x48   : > { %471 = vst [vmem:[%s431_s28 + $0x24] sm:$0xf] %v470_v41  ;;  %473 = vst [vmem:[%s431_s28 + $0x28] sm:$0xf] %v472_v42  ;;  %v476_v44 = vld [vmem:[%s2190_s10 + $0x60] sm:$0xf] }
  0x49   : > { %475 = vst [vmem:[%s431_s28 + $0x2c] sm:$0xf] %v474_v43  ;;  %v478_v45 = vld [vmem:[%s2190_s10 + $0x68] sm:$0xf]  ;;  %v480_v46 = vld [vmem:[%s2190_s10 + $0x70] sm:$0xf] }
  0x4a   : > { %477 = vst [vmem:[%s431_s28 + $0x30] sm:$0xf] %v476_v44  ;;  %479 = vst [vmem:[%s431_s28 + $0x34] sm:$0xf] %v478_v45  ;;  %v482_v47 = vld [vmem:[%s2190_s10 + $0x78] sm:$0xf] }
  0x4b   : > { %481 = vst [vmem:[%s431_s28 + $0x38] sm:$0xf] %v480_v46  ;;  %483 = vst [vmem:[%s431_s28 + $0x3c] sm:$0xf] %v482_v47 }
  0x4c PF: > { %p1535_p12 = scmp.ge.s32.totalorder %s2025_s22, 1  ;;  %p538_p13 = scmp.lt.s32.totalorder %s2025_s22, 5 }
  0x4e   : > { %p539_p0 = pnand %p1535_p12, %p538_p13 }
  0x4f   : > { %s2211_s11 = sand.u32 (!%p539_p0), 1, %s2001_s16   ;;  %s1575_s5 = sshll.u32 (!%p539_p0), %s2009_s18, 4 }
  0x50   : > { %542 = sbr.rel (%p539_p0) target bundleno = 901 (0x385), region = 143  ;;  %s2214_s12 = sshll.u32 (!%p539_p0), %s2211_s11, 6 }
  0x51   : > { %s554_s13 = scalar_lea.vmem (!%p539_p0), [#allocation3], %s2214_s12  ;;  %s2218_s14 = scalar_lea.vmem (!%p539_p0), [#allocation2], %s2214_s12 }
  0x52   : > { %s2250_s23 = scalar_lea.vmem (!%p539_p0), [#allocation4], %s2214_s12  ;;  %s1539_s24 = sshll.u32 (!%p539_p0), %s2211_s11, 7 }
  0x53   : > { %s2317_s27 = scalar_lea.vmem (!%p539_p0), [#allocation5], %s1539_s24  ;;  %s2453_s6 = sshll.u32 (!%p539_p0), %s2013_s19, 5 }
  0x54   : > { %s1245_s7 = sadd.s32 (!%p539_p0), %s2453_s6, %s1575_s5  ;;  %s1248_s10 = sshll.u32 (!%p539_p0), %s2317_s27, 4  ;;  %s2360_s10 = int_to_ptr.vmem [resolvable:$true] %s1248_s10 }
  0x55   : > { %v1853_v48 = vld [vmem:[%s554_s13 + $0x38] sm:$0xff]   ;;  %v1854_v49 = vld [vmem:[%s554_s13 + $0x30] sm:$0xff]   ;;  %v1855_v50 = vld [vmem:[%s554_s13 + $0x28] sm:$0xff]   ;;  %s1577_s9 = sshll.u32 %s1245_s7, 7  ;;  %s1933_s24 = scalar_lea.vmem %s2360_s10, 2048 }
  0x56   : > { %1716 = vmatprep.subr.bf16.mxu0 %v1853_v48  ;;  %v1599_v51 = vld [vmem:[%s2218_s14] sm:$0xff]   ;;  %v1857_v58 = vld [vmem:[%s554_s13 + $0x18] sm:$0xff]   ;;  %v1858_v59 = vld [vmem:[%s554_s13 + $0x10] sm:$0xff]   ;;  %p1934_p1 = scmp.ne.s32.totalorder %s2360_s10, %s1933_s24  ;;  %s2027_s0 = smov [#allocation5]  }
  0x57   : > { %1717 = vmatpush3.bf16.xpose.msra.mxu0 %v1853_v48  ;;  %v1600_v52 = vunpack.c.l.bf16 %v1599_v51  ;;  %v1601_v53 = vunpack.c.h.bf16 %v1599_v51  ;;  %v1856_v57 = vld [vmem:[%s554_s13 + $0x20] sm:$0xff]   ;;  %v1859_v60 = vld [vmem:[%s554_s13 + $0x8] sm:$0xff]   ;;  %v1671_v63 = vld [vmem:[%s2218_s14 + $0x10] sm:$0xff]   ;;  %s1937_s5 = sshll.u32 %s2027_s0, 4  ;;  %s1938_s5 = int_to_ptr.vmem [resolvable:$false] %s1937_s5 }
  0x58   : > { %1718 = vmatprep.subr.bf16.mxu0 %v1854_v49  ;;  %v1860_v61 = vld [vmem:[%s554_s13] sm:$0xff]   ;;  %v1670_v62 = vld [vmem:[%s2218_s14 + $0x8] sm:$0xff]   ;;  %v1608_v2 = vunpack.c.l.bf16 %v1671_v63  ;;  %v1609_v3 = vunpack.c.h.bf16 %v1671_v63  ;;  %v1672_v8 = vld [vmem:[%s2218_s14 + $0x18] sm:$0xff]   ;;  %p1935_p2 = pnand %p1934_p1, %p2115_p8  ;;  %p1940_p4 = scmp.lt.s32.totalorder %s2360_s10, %s1938_s5 }
  0x59   : > { %v632_v54 = vmul.f32 0.088388346, %v1600_v52  ;;  %v633_v55 = vmul.f32 0.088388346, %v1601_v53  ;;  %v1604_v0 = vunpack.c.l.bf16 %v1670_v62  ;;  %v1605_v1 = vunpack.c.h.bf16 %v1670_v62  ;;  %v1673_v9 = vld [vmem:[%s2218_s14 + $0x20] sm:$0xff]   ;;  %v1674_v20 = vld [vmem:[%s2218_s14 + $0x28] sm:$0xff]  }
  0x5a   : > { %v636_v6 = vmul.f32 0.088388346, %v1608_v2  ;;  %v637_v7 = vmul.f32 0.088388346, %v1609_v3  ;;  %v1612_v11 = vunpack.c.l.bf16 %v1672_v8  ;;  %v1613_v12 = vunpack.c.h.bf16 %v1672_v8  ;;  %v1675_v21 = vld [vmem:[%s2218_s14 + $0x30] sm:$0xff]   ;;  %v1676_v32 = vld [vmem:[%s2218_s14 + $0x38] sm:$0xff]   ;;  %s2358_s14 = scalar_lea.hbm %s2451_s3, %s1577_s9  ;;  %p1936_p3 = pneg %p1935_p2 }
  0x5b   : > { %v648_v56 = vpack.c.bf16 %v633_v55, %v632_v54  ;;  %v634_v4 = vmul.f32 0.088388346, %v1604_v0  ;;  %v635_v5 = vmul.f32 0.088388346, %v1605_v1  ;;  %v1616_v14 = vunpack.c.l.bf16 %v1673_v9 }
  0x5c   : > { %v650_v13 = vpack.c.bf16 %v637_v7, %v636_v6  ;;  %v1617_v15 = vunpack.c.h.bf16 %v1673_v9  ;;  %v638_v16 = vmul.f32 0.088388346, %v1612_v11  ;;  %v639_v17 = vmul.f32 0.088388346, %v1613_v12 }
  0x5d   : > { %1732 = vmatprep.mubr.bf16.mxu0 %v648_v56  ;;  %v649_v10 = vpack.c.bf16 %v635_v5, %v634_v4  ;;  %v640_v18 = vmul.f32 0.088388346, %v1616_v14  ;;  %v1620_v23 = vunpack.c.l.bf16 %v1674_v20  ;;  %v1621_v24 = vunpack.c.h.bf16 %v1674_v20  ;;  %v1861_v56 = vld [vmem:[%s2250_s23 + $0x38] sm:$0xff]  }
  0x5e   : > { %v641_v19 = vmul.f32 0.088388346, %v1617_v15  ;;  %v651_v22 = vpack.c.bf16 %v639_v17, %v638_v16  ;;  %v1624_v26 = vunpack.c.l.bf16 %v1675_v21  ;;  %v1625_v27 = vunpack.c.h.bf16 %v1675_v21  ;;  %1748 = vmatprep.subr.bf16.mxu1 %v1861_v56 }
  0x5f   : > { %1719 = vmatpush3.bf16.xpose.msra.mxu0 %v1854_v49  ;;  %v642_v28 = vmul.f32 0.088388346, %v1620_v23  ;;  %v643_v29 = vmul.f32 0.088388346, %v1621_v24  ;;  %v1628_v34 = vunpack.c.l.bf16 %v1676_v32  ;;  %v1629_v35 = vunpack.c.h.bf16 %v1676_v32  ;;  %1749 = vmatpush3.bf16.msra.mxu1 %v1861_v56 }
  0x60   : > { %1720 = vmatprep.subr.bf16.mxu0 %v1855_v50  ;;  %v652_v25 = vpack.c.bf16 %v641_v19, %v640_v18  ;;  %v644_v30 = vmul.f32 0.088388346, %v1624_v26  ;;  %v645_v31 = vmul.f32 0.088388346, %v1625_v27 }
  0x61   : > { %v653_v33 = vpack.c.bf16 %v643_v29, %v642_v28  ;;  %v646_v37 = vmul.f32 0.088388346, %v1628_v34  ;;  %v647_v38 = vmul.f32 0.088388346, %v1629_v35 }
  0x62   : > { %v654_v36 = vpack.c.bf16 %v645_v31, %v644_v30 }
  0x63   : > { %v655_v39 = vpack.c.bf16 %v647_v38, %v646_v37 }
  0x67   : > { %1721 = vmatpush3.bf16.xpose.msra.mxu0 %v1855_v50 }
  0x68   : > { %1722 = vmatprep.subr.bf16.mxu0 %v1856_v57 }
  0x6f   : > { %1723 = vmatpush3.bf16.xpose.msra.mxu0 %v1856_v57  ;;  %v1862_v57 = vld [vmem:[%s2250_s23 + $0x30] sm:$0xff]  }
  0x70   : > { %1724 = vmatprep.subr.bf16.mxu0 %v1857_v58  ;;  %1750 = vmatprep.subr.bf16.mxu1 %v1862_v57 }
  0x71   : > { %1751 = vmatpush3.bf16.msra.mxu1 %v1862_v57  ;;  %v1866_v57 = vld [vmem:[%s2250_s23 + $0x10] sm:$0xff]  }
  0x77   : > { %1725 = vmatpush3.bf16.xpose.msra.mxu0 %v1857_v58 }
  0x78   : > { %1726 = vmatprep.subr.bf16.mxu0 %v1858_v59 }
  0x7f   : > { %1727 = vmatpush3.bf16.xpose.msra.mxu0 %v1858_v59 }
  0x80   : > { %1728 = vmatprep.subr.bf16.mxu0 %v1859_v60 }
  0x87   : > { %1729 = vmatpush3.bf16.xpose.msra.mxu0 %v1859_v60 }
  0x88   : > { %1730 = vmatprep.subr.bf16.mxu0 %v1860_v61 }
  0x8f   : > { %1731 = vmatpush3.bf16.xpose.msra.mxu0 %v1860_v61 }
  0x96   : > { %1733 = vmatmul.mubr.bf16.vlgmr.msra.gmra.mxu0 %v649_v10 }
  0x97   : > { %1736 = vmatprep.mubr.bf16.mxu0 %v650_v13 }
  0x9e   : > { %1737 = vmatmul.mubr.bf16.gmra.mxu0 %v651_v22 }
  0x9f   : > { %1740 = vmatprep.mubr.bf16.mxu0 %v652_v25 }
  0xa6   : > { %1741 = vmatmul.mubr.bf16.gmra.mxu0 %v653_v33 }
  0xa7   : > { %1744 = vmatprep.mubr.bf16.mxu0 %v654_v36 }
  0xae   : > { %1745 = vmatmul.mubr.bf16.gmra.mxu0 %v655_v39 }
 0x156   : > { %v1734_v40 = vpop.f32.mrf.mxu0 }
 0x157   : > { %837 = vmax.xlane.f32.xlu1 %v1734_v40 }
 0x158   : > { %v770_v41 = vpop.f32.mrf.mxu0 }
 0x159   : > { %833 = vmax.xlane.f32.xlu0 %v770_v41 }
 0x15a   : > { %v1735_v42 = vpop.f32.mrf.mxu0 }
 0x15b   : > { %839 = vmax.xlane.f32.xlu1 %v1735_v42 }
 0x15c   : > { %v773_v43 = vpop.f32.mrf.mxu0 }
 0x15d   : > { %835 = vmax.xlane.f32.xlu0 %v773_v43 }
 0x15e   : > { %v1738_v44 = vpop.f32.mrf.mxu0 }
 0x160   : > { %v786_v45 = vpop.f32.mrf.mxu0 }
 0x161   : > { %841 = vmax.xlane.f32.xlu0 %v786_v45 }
 0x162   : > { %v1739_v46 = vpop.f32.mrf.mxu0 }
 0x164   : > { %v789_v47 = vpop.f32.mrf.mxu0 }
 0x165   : > { %845 = vmax.xlane.f32.xlu0 %v1738_v44  ;;  %843 = vmax.xlane.f32.xlu1 %v789_v47 }
 0x166   : > { %v2228_v48 = vpop.f32.mrf.mxu0 }
 0x168   : > { %v802_v49 = vpop.f32.mrf.mxu0 }
 0x169   : > { %847 = vmax.xlane.f32.xlu1 %v1739_v46  ;;  %849 = vmax.xlane.f32.xlu0 %v802_v49 }
 0x16a   : > { %v2230_v50 = vpop.f32.mrf.mxu0 }
 0x16c   : > { %v2232_v51 = vpop.f32.mrf.mxu0 }
 0x16d   : > { %853 = vmax.xlane.f32.xlu0 %v2228_v48  ;;  %851 = vmax.xlane.f32.xlu1 %v2232_v51 }
 0x16e   : > { %v2236_v52 = vpop.f32.mrf.mxu0 }
 0x170   : > { %v2238_v53 = vpop.f32.mrf.mxu0 }
 0x171   : > { %855 = vmax.xlane.f32.xlu1 %v2230_v50  ;;  %857 = vmax.xlane.f32.xlu0 %v2238_v53 }
 0x172   : > { %v2242_v54 = vpop.f32.mrf.mxu0 }
 0x174   : > { %v2244_v55 = vpop.f32.mrf.mxu0 }
 0x175   : > { %861 = vmax.xlane.f32.xlu0 %v2236_v52  ;;  %859 = vmax.xlane.f32.xlu1 %v2244_v55 }
 0x179   : > { %863 = vmax.xlane.f32.xlu1 %v2242_v54 }
 0x1e0   : > { %v838_v58 = vpop.xlane.xlu1 %837 }
 0x1e1   : > { %v867_v59 = vsub.f32 %v1734_v40, %v838_v58 }
 0x1e2   : > { %v834_v60 = vpop.xlane.xlu0 %833 }
 0x1e3   : > { %v865_v61 = vsub.f32 %v770_v41, %v834_v60  ;;  %v885_v0 = vmul.f32 1.442695, %v867_v59 }
 0x1e4   : > { %v840_v62 = vpop.xlane.xlu1 %839 }
 0x1e5   : > { %v881_v63 = vmul.f32 1.442695, %v865_v61  ;;  %v868_v1 = vsub.f32 %v1735_v42, %v840_v62  ;;  %v1863_v42 = vld [vmem:[%s2250_s23 + $0x28] sm:$0xff]  }
 0x1e6   : > { %v836_v2 = vpop.xlane.xlu0 %835  ;;  %1752 = vmatprep.subr.bf16.mxu1 %v1863_v42  ;;  %v1867_v61 = vld [vmem:[%s2250_s23 + $0x8] sm:$0xff]  }
 0x1e7   : > { %1869 = vpow2.f32 %v881_v63  ;;  %v866_v3 = vsub.f32 %v773_v43, %v836_v2  ;;  %v887_v5 = vmul.f32 1.442695, %v868_v1  ;;  %1753 = vmatpush3.bf16.msra.mxu1 %v1863_v42  ;;  %v1868_v63 = vld [vmem:[%s2250_s23] sm:$0xff]  }
 0x1e8   : > { %1871 = vpow2.f32 %v885_v0 }
 0x1e9   : > { %v883_v4 = vmul.f32 1.442695, %v866_v3 }
 0x1ea   : > { %v842_v6 = vpop.xlane.xlu0 %841 }
 0x1eb   : > { %1873 = vpow2.f32 %v883_v4  ;;  %v869_v7 = vsub.f32 %v786_v45, %v842_v6 }
 0x1ec   : > { %1875 = vpow2.f32 %v887_v5 }
 0x1ed   : > { %v889_v8 = vmul.f32 1.442695, %v869_v7 }
 0x1ee   : > { %v846_v9 = vpop.xlane.xlu0 %845  ;;  %v844_v10 = vpop.xlane.xlu1 %843 }
 0x1ef   : > { %1877 = vpow2.f32 %v889_v8  ;;  %v871_v11 = vsub.f32 %v1738_v44, %v846_v9  ;;  %v870_v12 = vsub.f32 %v789_v47, %v844_v10 }
 0x1f1   : > { %v893_v13 = vmul.f32 1.442695, %v871_v11  ;;  %v891_v14 = vmul.f32 1.442695, %v870_v12 }
 0x1f2   : > { %v848_v15 = vpop.xlane.xlu1 %847  ;;  %v850_v16 = vpop.xlane.xlu0 %849 }
 0x1f3   : > { %1879 = vpow2.f32 %v893_v13  ;;  %v872_v17 = vsub.f32 %v1739_v46, %v848_v15  ;;  %v873_v18 = vsub.f32 %v802_v49, %v850_v16 }
 0x1f4   : > { %v2254_v19 = vpop.eup %1869  ;;  %1881 = vpow2.f32 %v891_v14 }
 0x1f5   : > { %v895_v20 = vmul.f32 1.442695, %v872_v17  ;;  %v897_v21 = vmul.f32 1.442695, %v873_v18  ;;  %913 = vadd.xlane.f32.xlu0 %v2254_v19  ;;  %v2257_v24 = vpop.eup %1871 }
 0x1f6   : > { %v854_v22 = vpop.xlane.xlu0 %853  ;;  %v852_v23 = vpop.xlane.xlu1 %851 }
 0x1f7   : > { %1883 = vpow2.f32 %v895_v20  ;;  %v875_v25 = vsub.f32 %v2228_v48, %v854_v22  ;;  %v874_v26 = vsub.f32 %v2232_v51, %v852_v23 }
 0x1f8   : > { %v2261_v27 = vpop.eup %1873  ;;  %1885 = vpow2.f32 %v897_v21 }
 0x1f9   : > { %v901_v28 = vmul.f32 1.442695, %v875_v25  ;;  %v899_v29 = vmul.f32 1.442695, %v874_v26  ;;  %917 = vadd.xlane.f32.xlu0 %v2257_v24  ;;  %915 = vadd.xlane.f32.xlu1 %v2261_v27  ;;  %v2265_v32 = vpop.eup %1875 }
 0x1fa   : > { %v856_v30 = vpop.xlane.xlu1 %855  ;;  %v858_v31 = vpop.xlane.xlu0 %857 }
 0x1fb   : > { %1887 = vpow2.f32 %v901_v28  ;;  %v876_v33 = vsub.f32 %v2230_v50, %v856_v30  ;;  %v877_v34 = vsub.f32 %v2238_v53, %v858_v31  ;;  %v1864_v50 = vld [vmem:[%s2250_s23 + $0x20] sm:$0xff]  }
 0x1fc   : > { %v2269_v35 = vpop.eup %1877  ;;  %1889 = vpow2.f32 %v899_v29  ;;  %1754 = vmatprep.subr.bf16.mxu1 %v1864_v50 }
 0x1fd   : > { %v903_v36 = vmul.f32 1.442695, %v876_v33  ;;  %v905_v37 = vmul.f32 1.442695, %v877_v34  ;;  %921 = vadd.xlane.f32.xlu0 %v2269_v35  ;;  %919 = vadd.xlane.f32.xlu1 %v2265_v32 }
 0x1fe   : > { %v862_v38 = vpop.xlane.xlu0 %861  ;;  %v860_v39 = vpop.xlane.xlu1 %859  ;;  %1755 = vmatpush3.bf16.msra.mxu1 %v1864_v50 }
 0x1ff   : > { %1891 = vpow2.f32 %v903_v36  ;;  %v879_v40 = vsub.f32 %v2236_v52, %v862_v38  ;;  %v878_v41 = vsub.f32 %v2244_v55, %v860_v39  ;;  %v1865_v55 = vld [vmem:[%s2250_s23 + $0x18] sm:$0xff]   ;;  %s1227_s23 = scalar_lea.sflag [#allocation6], %s2211_s11 }
 0x200   : > { %v2276_v43 = vpop.eup %1879  ;;  %1893 = vpow2.f32 %v905_v37  ;;  %1756 = vmatprep.subr.bf16.mxu1 %v1865_v55 }
 0x201   : > { %v2278_v44 = vpop.eup %1881  ;;  %v909_v45 = vmul.f32 1.442695, %v879_v40  ;;  %v907_v46 = vmul.f32 1.442695, %v878_v41  ;;  %925 = vadd.xlane.f32.xlu0 %v2276_v43 }
 0x202   : > { %923 = vadd.xlane.f32.xlu1 %v2278_v44  ;;  %v864_v47 = vpop.xlane.xlu1 %863  ;;  %1757 = vmatpush3.bf16.msra.mxu1 %v1865_v55 }
 0x203   : > { %1895 = vpow2.f32 %v909_v45  ;;  %v880_v48 = vsub.f32 %v2242_v54, %v864_v47  ;;  %1758 = vmatprep.subr.bf16.mxu1 %v1866_v57 }
 0x204   : > { %v2283_v49 = vpop.eup %1883  ;;  %1897 = vpow2.f32 %v907_v46 }
 0x205   : > { %v2286_v51 = vpop.eup %1885  ;;  %v911_v52 = vmul.f32 1.442695, %v880_v48 }
 0x206   : > { %929 = vadd.xlane.f32.xlu0 %v2286_v51  ;;  %927 = vadd.xlane.f32.xlu1 %v2283_v49 }
 0x207   : > { %1899 = vpow2.f32 %v911_v52  ;;  %1759 = vmatpush3.bf16.msra.mxu1 %v1866_v57 }
 0x208   : > { %v2290_v53 = vpop.eup %1887  ;;  %1760 = vmatprep.subr.bf16.mxu1 %v1867_v61 }
 0x209   : > { %v2293_v54 = vpop.eup %1889 }
 0x20a   : > { %933 = vadd.xlane.f32.xlu0 %v2290_v53  ;;  %931 = vadd.xlane.f32.xlu1 %v2293_v54 }
 0x20b   : > { %1761 = vmatpush3.bf16.msra.mxu1 %v1867_v61 }
 0x20c   : > { %v2297_v56 = vpop.eup %1891  ;;  %1762 = vmatprep.subr.bf16.mxu1 %v1868_v63 }
 0x20d   : > { %v2300_v58 = vpop.eup %1893 }
 0x20e   : > { %937 = vadd.xlane.f32.xlu0 %v2300_v58  ;;  %935 = vadd.xlane.f32.xlu1 %v2297_v56 }
 0x20f   : > { %1763 = vmatpush3.bf16.msra.mxu1 %v1868_v63 }
 0x210   : > { %v2304_v59 = vpop.eup %1895 }
 0x211   : > { %v2306_v60 = vpop.eup %1897 }
 0x212   : > { %941 = vadd.xlane.f32.xlu0 %v2304_v59  ;;  %939 = vadd.xlane.f32.xlu1 %v2306_v60 }
 0x214   : > { %v2311_v62 = vpop.eup %1899 }
 0x216   : > { %943 = vadd.xlane.f32.xlu1 %v2311_v62 }
 0x27e   : > { %v914_v0 = vpop.xlane.xlu0 %913 }
 0x27f   : > { %1901 = vrcp.f32 %v914_v0 }
 0x282   : > { %v918_v1 = vpop.xlane.xlu0 %917  ;;  %v916_v2 = vpop.xlane.xlu1 %915 }
 0x283   : > { %1903 = vrcp.f32 %v918_v1 }
 0x284   : > { %1905 = vrcp.f32 %v916_v2 }
 0x286   : > { %v922_v3 = vpop.xlane.xlu0 %921  ;;  %v920_v4 = vpop.xlane.xlu1 %919 }
 0x287   : > { %1907 = vrcp.f32 %v922_v3 }
 0x288   : > { %1909 = vrcp.f32 %v920_v4 }
 0x28a   : > { %v926_v5 = vpop.xlane.xlu0 %925 }
 0x28b   : > { %1911 = vrcp.f32 %v926_v5  ;;  %v924_v6 = vpop.xlane.xlu1 %923 }
 0x28c   : > { %v1902_v7 = vpop.eup %1901  ;;  %1913 = vrcp.f32 %v924_v6 }
 0x28d   : > { %v961_v8 = vmul.f32 %v1902_v7, %v2254_v19 }
 0x28f   : > { %v930_v9 = vpop.xlane.xlu0 %929  ;;  %v928_v10 = vpop.xlane.xlu1 %927  ;;  %977 = vst [vmem:[%s2317_s27] sm:$0xff] %v961_v8 }
 0x290   : > { %v1904_v11 = vpop.eup %1903  ;;  %1915 = vrcp.f32 %v930_v9 }
 0x291   : > { %v1906_v12 = vpop.eup %1905  ;;  %1917 = vrcp.f32 %v928_v10  ;;  %v963_v13 = vmul.f32 %v1904_v11, %v2257_v24 }
 0x292   : > { %v962_v14 = vmul.f32 %v1906_v12, %v2261_v27 }
 0x293   : > { %v934_v15 = vpop.xlane.xlu0 %933  ;;  %v932_v16 = vpop.xlane.xlu1 %931  ;;  %979 = vst [vmem:[%s2317_s27 + $0x10] sm:$0xff] %v963_v13 }
 0x294   : > { %v1908_v17 = vpop.eup %1907  ;;  %1919 = vrcp.f32 %v934_v15  ;;  %978 = vst [vmem:[%s2317_s27 + $0x8] sm:$0xff] %v962_v14  ;;  %v993_v18 = vpack.c.bf16 %v962_v14, %v961_v8 }
 0x295   : > { %v1910_v19 = vpop.eup %1909  ;;  %1921 = vrcp.f32 %v932_v16  ;;  %v965_v20 = vmul.f32 %v1908_v17, %v2269_v35 }
 0x296   : > { %1764 = vmatprep.mubr.bf16.mxu1 %v993_v18  ;;  %v964_v21 = vmul.f32 %v1910_v19, %v2265_v32 }
 0x297   : > { %v938_v22 = vpop.xlane.xlu0 %937  ;;  %v936_v23 = vpop.xlane.xlu1 %935  ;;  %981 = vst [vmem:[%s2317_s27 + $0x20] sm:$0xff] %v965_v20 }
 0x298   : > { %v1912_v24 = vpop.eup %1911  ;;  %1923 = vrcp.f32 %v938_v22  ;;  %980 = vst [vmem:[%s2317_s27 + $0x18] sm:$0xff] %v964_v21  ;;  %v994_v25 = vpack.c.bf16 %v964_v21, %v963_v13 }
 0x299   : > { %v1914_v26 = vpop.eup %1913  ;;  %1925 = vrcp.f32 %v936_v23  ;;  %v967_v27 = vmul.f32 %v1912_v24, %v2276_v43 }
 0x29a   : > { %1765 = vmatmul.mubr.bf16.vlgmr.msra.gmra.mxu1 %v994_v25  ;;  %v966_v28 = vmul.f32 %v1914_v26, %v2278_v44 }
 0x29b   : > { %v942_v29 = vpop.xlane.xlu0 %941  ;;  %v940_v30 = vpop.xlane.xlu1 %939  ;;  %983 = vst [vmem:[%s2317_s27 + $0x30] sm:$0xff] %v967_v27 }
 0x29c   : > { %1927 = vrcp.f32 %v942_v29  ;;  %982 = vst [vmem:[%s2317_s27 + $0x28] sm:$0xff] %v966_v28  ;;  %v995_v31 = vpack.c.bf16 %v966_v28, %v965_v20 }
 0x29d   : > { %v1916_v32 = vpop.eup %1915  ;;  %1929 = vrcp.f32 %v940_v30 }
 0x29e   : > { %v1918_v33 = vpop.eup %1917  ;;  %1768 = vmatprep.mubr.bf16.mxu1 %v995_v31  ;;  %v969_v34 = vmul.f32 %v1916_v32, %v2286_v51 }
 0x29f   : > { %v944_v35 = vpop.xlane.xlu1 %943  ;;  %v968_v36 = vmul.f32 %v1918_v33, %v2283_v49 }
 0x2a0   : > { %1931 = vrcp.f32 %v944_v35  ;;  %985 = vst [vmem:[%s2317_s27 + $0x40] sm:$0xff] %v969_v34 }
 0x2a1   : > { %v1920_v37 = vpop.eup %1919  ;;  %984 = vst [vmem:[%s2317_s27 + $0x38] sm:$0xff] %v968_v36  ;;  %v996_v38 = vpack.c.bf16 %v968_v36, %v967_v27 }
 0x2a2   : > { %v1922_v39 = vpop.eup %1921  ;;  %v971_v40 = vmul.f32 %v1920_v37, %v2290_v53 }
 0x2a3   : > { %1769 = vmatmul.mubr.bf16.gmra.mxu1 %v996_v38  ;;  %v970_v41 = vmul.f32 %v1922_v39, %v2293_v54 }
 0x2a4   : > { %987 = vst [vmem:[%s2317_s27 + $0x50] sm:$0xff] %v971_v40 }
 0x2a5   : > { %v1924_v42 = vpop.eup %1923  ;;  %986 = vst [vmem:[%s2317_s27 + $0x48] sm:$0xff] %v970_v41  ;;  %v997_v43 = vpack.c.bf16 %v970_v41, %v969_v34 }
 0x2a6   : > { %v1926_v44 = vpop.eup %1925  ;;  %v973_v45 = vmul.f32 %v1924_v42, %v2300_v58 }
 0x2a7   : > { %1772 = vmatprep.mubr.bf16.mxu1 %v997_v43  ;;  %v972_v46 = vmul.f32 %v1926_v44, %v2297_v56 }
 0x2a8   : > { %989 = vst [vmem:[%s2317_s27 + $0x60] sm:$0xff] %v973_v45 }
 0x2a9   : > { %v1928_v47 = vpop.eup %1927  ;;  %988 = vst [vmem:[%s2317_s27 + $0x58] sm:$0xff] %v972_v46  ;;  %v998_v48 = vpack.c.bf16 %v972_v46, %v971_v40 }
 0x2aa   : > { %v1930_v49 = vpop.eup %1929  ;;  %v975_v50 = vmul.f32 %v1928_v47, %v2304_v59 }
 0x2ab   : > { %1773 = vmatmul.mubr.bf16.gmra.mxu1 %v998_v48  ;;  %v974_v51 = vmul.f32 %v1930_v49, %v2306_v60 }
 0x2ac   : > { %991 = vst [vmem:[%s2317_s27 + $0x70] sm:$0xff] %v975_v50 }
 0x2ad   : > { %v1932_v52 = vpop.eup %1931  ;;  %990 = vst [vmem:[%s2317_s27 + $0x68] sm:$0xff] %v974_v51  ;;  %v999_v53 = vpack.c.bf16 %v974_v51, %v973_v45 }
 0x2ae   : > { %v976_v55 = vmul.f32 %v1932_v52, %v2311_v62 }
 0x2af   : > { %1776 = vmatprep.mubr.bf16.mxu1 %v999_v53 }
 0x2b0   : > { %992 = vst [vmem:[%s2317_s27 + $0x78] sm:$0xff] %v976_v55  ;;  %v1000_v54 = vpack.c.bf16 %v976_v55, %v975_v50  ;;  %s1939_s27 = scalar_lea.vmem %s1938_s5, 4096 }
 0x2b1   : > { %p1941_p5 = scmp.lt.s32.totalorder %s1939_s27, %s1933_s24 }
 0x2b3   : > { %1777 = vmatmul.mubr.bf16.gmra.mxu1 %v1000_v54  ;;  %p1942_p6 = por %p1941_p5, %p1940_p4 }
 0x2b5   : > { %p1943_p7 = pnand %p1942_p6, %p1936_p3 }
 0x2b7   : > { %1946 = shalt.err (!%p1943_p7)
}
 0x2b8   : > { %s1947_s7 = scalar_lea.hbm %s2358_s14, 2048  ;;  %s1951_s0 = scalar_lea.hbm %s2451_s3, 8192 }
 0x2b9   : > { %p1948_p10 = scmp.ne.s32.totalorder %s2358_s14, %s1947_s7  ;;  %p1952_p13 = scmp.lt.s32.totalorder %s2358_s14, %s2451_s3 }
 0x2ba   : > { %p1953_p0 = scmp.lt.s32.totalorder %s1951_s0, %s1947_s7 }
 0x2bb   : > { %p1949_p11 = pnand %p1948_p10, %p2115_p8 }
 0x2bc   : > { %p1954_p1 = por %p1953_p0, %p1952_p13 }
 0x2bd   : > { %p1950_p12 = pneg %p1949_p11 }
 0x2bf   : > { %p1955_p2 = pnand %p1954_p1, %p1950_p12 }
 0x2c1   : > { %1958 = shalt.err (!%p1955_p2)
}
 0x2c2   : > { %s2028_s24 = smov 128   ;;  %s2029_s5 = smov 8  }
 0x2c3   : > { %1780 = dma.vmem_to_hbm [thread:$0]  (%p2115_p8), %s2360_s10, 2048, %s2358_s14, %s1227_s23, %s2028_s24, %s2028_s24, %s2029_s5  }
 0x2c4   : > { %s2386_s6 = scalar_lea.vmem [#allocation7], %s2214_s12  ;;  %s2459_s11 = sshll.u32 (%p2115_p8), %s2013_s19, 5 }
 0x2c5   : > { %s1262_s12 = sadd.s32 (%p2115_p8), %s2009_s18, %s2459_s11 }
 0x2c6   : > { %s1579_s10 = sshll.u32 (%p2115_p8), %s1262_s12, 2 }
 0x2c7   : > { %s1264_s14 = scalar_lea.vmem (%p2115_p8), %s2452_s4, %s1579_s10 }
 0x35a   : > { %v1766_v56 = vpop.f32.mrf.mxu1 }
 0x35c   : > { %v1083_v57 = vpop.f32.mrf.mxu1 }
 0x35e   : > { %v1767_v58 = vpop.f32.mrf.mxu1 }
 0x35f   : > { %v1638_v59 = vpack.c.bf16 %v1767_v58, %v1766_v56 }
 0x360   : > { %v1086_v60 = vpop.f32.mrf.mxu1 }
 0x361   : > { %1677 = vst [vmem:[%s2386_s6 + $0x8] sm:$0xff] %v1638_v59   ;;  %v1633_v61 = vpack.c.bf16 %v1086_v60, %v1083_v57 }
 0x363   : > { %1634 = vst [vmem:[%s2386_s6] sm:$0xff] %v1633_v61   ;;  %v1770_v62 = vpop.f32.mrf.mxu1 }
 0x365   : > { %v1099_v63 = vpop.f32.mrf.mxu1 }
 0x367   : > { %v1771_v0 = vpop.f32.mrf.mxu1 }
 0x368   : > { %v1648_v1 = vpack.c.bf16 %v1771_v0, %v1770_v62  ;;  %v1285_v18 = vld [vmem:[%s2386_s6 + $0x8] sm:$0xf] (%p2115_p8)  ;;  %v1287_v19 = vld [vmem:[%s2386_s6 + $0xc] sm:$0xf] (%p2115_p8) }
 0x369   : > { %v1102_v2 = vpop.f32.mrf.mxu1  ;;  %1286 = vst [vmem:[%s1264_s14 + $0x10] sm:$0xf] (%p2115_p8), %v1285_v18  ;;  %1288 = vst [vmem:[%s1264_s14 + $0x18] sm:$0xf] (%p2115_p8), %v1287_v19 }
 0x36a   : > { %1679 = vst [vmem:[%s2386_s6 + $0x18] sm:$0xff] %v1648_v1   ;;  %v1643_v3 = vpack.c.bf16 %v1102_v2, %v1099_v63  ;;  %v1281_v16 = vld [vmem:[%s2386_s6] sm:$0xf] (%p2115_p8)  ;;  %v1283_v17 = vld [vmem:[%s2386_s6 + $0x4] sm:$0xf] (%p2115_p8) }
 0x36b   : > { %v1774_v4 = vpop.f32.mrf.mxu1  ;;  %1282 = vst [vmem:[%s1264_s14] sm:$0xf] (%p2115_p8), %v1281_v16  ;;  %1284 = vst [vmem:[%s1264_s14 + $0x8] sm:$0xf] (%p2115_p8), %v1283_v17 }
 0x36c   : > { %1678 = vst [vmem:[%s2386_s6 + $0x10] sm:$0xff] %v1643_v3  }
 0x36d   : > { %v1115_v5 = vpop.f32.mrf.mxu1 }
 0x36f   : > { %v1775_v6 = vpop.f32.mrf.mxu1 }
 0x370   : > { %v1658_v7 = vpack.c.bf16 %v1775_v6, %v1774_v4 }
 0x371   : > { %v1118_v8 = vpop.f32.mrf.mxu1  ;;  %v1293_v22 = vld [vmem:[%s2386_s6 + $0x18] sm:$0xf] (%p2115_p8)  ;;  %v1295_v23 = vld [vmem:[%s2386_s6 + $0x1c] sm:$0xf] (%p2115_p8) }
 0x372   : > { %1681 = vst [vmem:[%s2386_s6 + $0x28] sm:$0xff] %v1658_v7   ;;  %v1653_v9 = vpack.c.bf16 %v1118_v8, %v1115_v5  ;;  %1294 = vst [vmem:[%s1264_s14 + $0x30] sm:$0xf] (%p2115_p8), %v1293_v22 }
 0x373   : > { %v1778_v10 = vpop.f32.mrf.mxu1  ;;  %v1289_v20 = vld [vmem:[%s2386_s6 + $0x10] sm:$0xf] (%p2115_p8)  ;;  %v1291_v21 = vld [vmem:[%s2386_s6 + $0x14] sm:$0xf] (%p2115_p8)  ;;  %1296 = vst [vmem:[%s1264_s14 + $0x38] sm:$0xf] (%p2115_p8), %v1295_v23 }
 0x374   : > { %1680 = vst [vmem:[%s2386_s6 + $0x20] sm:$0xff] %v1653_v9   ;;  %1290 = vst [vmem:[%s1264_s14 + $0x20] sm:$0xf] (%p2115_p8), %v1289_v20 }
 0x375   : > { %v1131_v11 = vpop.f32.mrf.mxu1  ;;  %1292 = vst [vmem:[%s1264_s14 + $0x28] sm:$0xf] (%p2115_p8), %v1291_v21 }
 0x377   : > { %v1779_v12 = vpop.f32.mrf.mxu1 }
 0x378   : > { %v1668_v13 = vpack.c.bf16 %v1779_v12, %v1778_v10  ;;  %1257 = sbr.rel (!%p2115_p8) target bundleno = 901 (0x385), region = 163 }
 0x379   : > { %v1134_v14 = vpop.f32.mrf.mxu1  ;;  %v1301_v26 = vld [vmem:[%s2386_s6 + $0x28] sm:$0xf] (%p2115_p8)  ;;  %v1303_v27 = vld [vmem:[%s2386_s6 + $0x2c] sm:$0xf] (%p2115_p8) }
 0x37a   : > { %1683 = vst [vmem:[%s2386_s6 + $0x38] sm:$0xff] %v1668_v13   ;;  %v1663_v15 = vpack.c.bf16 %v1134_v14, %v1131_v11  ;;  %1302 = vst [vmem:[%s1264_s14 + $0x50] sm:$0xf] (%p2115_p8), %v1301_v26 }
 0x37b   : > { %v1297_v24 = vld [vmem:[%s2386_s6 + $0x20] sm:$0xf] (%p2115_p8)  ;;  %v1299_v25 = vld [vmem:[%s2386_s6 + $0x24] sm:$0xf] (%p2115_p8)  ;;  %1304 = vst [vmem:[%s1264_s14 + $0x58] sm:$0xf] (%p2115_p8), %v1303_v27 }
 0x37c   : > { %1682 = vst [vmem:[%s2386_s6 + $0x30] sm:$0xff] %v1663_v15   ;;  %1298 = vst [vmem:[%s1264_s14 + $0x40] sm:$0xf] (%p2115_p8), %v1297_v24 }
 0x37d   : > { %1300 = vst [vmem:[%s1264_s14 + $0x48] sm:$0xf] %v1299_v25 }
 0x381   : > { %v1309_v30 = vld [vmem:[%s2386_s6 + $0x38] sm:$0xf]  ;;  %v1311_v31 = vld [vmem:[%s2386_s6 + $0x3c] sm:$0xf] }
 0x382   : > { %1310 = vst [vmem:[%s1264_s14 + $0x70] sm:$0xf] %v1309_v30  ;;  %1312 = vst [vmem:[%s1264_s14 + $0x78] sm:$0xf] %v1311_v31 }
 0x383   : > { %v1305_v28 = vld [vmem:[%s2386_s6 + $0x30] sm:$0xf]  ;;  %v1307_v29 = vld [vmem:[%s2386_s6 + $0x34] sm:$0xf] }
 0x384   : > { %1306 = vst [vmem:[%s1264_s14 + $0x60] sm:$0xf] %v1305_v28  ;;  %1308 = vst [vmem:[%s1264_s14 + $0x68] sm:$0xf] %v1307_v29 }
 0x385 PF: > { %p1786_p8 = scmp.ge.s32.totalorder %s2025_s22, 2  ;;  %s1374_s18 = sand.u32 1, %s1997_s15  }
 0x386   : > { %s1375_s23 = scalar_lea.sflag [#allocation6], %s1374_s18 }
 0x387   : > { %p1783_p3 = pnand %p1786_p8, %p2119_p9 }
 0x389   : > { %p1784_p4 = pneg %p1783_p3 }
 0x38b   : > { %1992 = dma.done.wait (%p1784_p4), %s1375_s23, 2048  }
 0x38c   : > { %1994 = vsyncadd (%p1784_p4), %s1375_s23, 4294965248  ;;  %s18_s22 = sadd.s32 1, %s2025_s22   ;;  %s2460_s15 = smov %s2001_s16 }
 0x38d   : > { %p15_p5 = scmp.ge.s32.totalorder %s18_s22, 6   ;;  %s2461_s16 = smov %s2005_s17 }
 0x38e   : > { %s2462_s17 = smov %s2127_s8  ;;  %s2463_s18 = smov %s2017_s20 }
 0x38f   : > { %s2464_s19 = smov %s2021_s21  ;;  %s2465_s20 = smov %s2468_s25 }
 0x390   : > { %s2466_s21 = smov %s2472_s26  ;;  %17 = sbr.rel (!%p15_p5) target bundleno = 7 (0x7), region = 264 }
 0x395   :  { %1387 = vsyncpa [#allocation6], 1 }
 0x396   :  { %1389 = vsyncpa [#allocation6 + $0x1], 1 }

// kernel: multihead_self_attention_forward.3
= control target key start
LH: loop header
LB: loop body
LE: loop exit
PB: predicated region body
PF: predicated region fallthrough
CT: control target
= control target key end

     0   :  { %s2267_s30 = smov 0   ;;  %s2866_s0 = inlined_call_operand.vmem [shape: f32[2,128,256], index: 0, kind: input, shape index: {}]   ;;  %s2867_s1 = inlined_call_operand.vmem [shape: bf16[256,256], index: 1, kind: input, shape index: {}]   ;;  %s2868_s2 = inlined_call_operand.vmem [shape: bf16[256,256], index: 2, kind: input, shape index: {}]   ;;  %s2869_s3 = inlined_call_operand.vmem [shape: bf16[256,256], index: 3, kind: input, shape index: {}]   ;;  %s2870_s4 = inlined_call_operand.vmem [shape: f32[1,256], index: 4, kind: input, shape index: {}]   ;;  %s2871_s5 = inlined_call_operand.vmem [shape: f32[1,256], index: 5, kind: input, shape index: {}]   ;;  %s2872_s6 = inlined_call_operand.vmem [shape: f32[1,256], index: 6, kind: input, shape index: {}]   ;;  %s2873_s7 = inlined_call_operand.vmem [shape: bf16[2,128,256], index: 7, kind: output, shape index: {0}]   ;;  %s2874_s8 = inlined_call_operand.vmem [shape: bf16[2,128,256], index: 8, kind: output, shape index: {1}]   ;;  %s2875_s9 = inlined_call_operand.vmem [shape: bf16[2,128,256], index: 9, kind: output, shape index: {2}]  }
   0x1 LB: > { %s1814_s10 = sadd.s32 4294967295, %s2215_s30   ;;  %p1818_p0 = scmp.ge.s32.totalorder %s2215_s30, 1  ;;  %s2215_s30 = sphi %s2267_s30, %s20_s30  }
   0x2   : > { %p292_p1 = scmp.lt.s32.totalorder %s2215_s30, 3 }
   0x4   : > { %p293_p2 = pnand %p1818_p0, %p292_p1 }
   0x5   : > { %p338_p3 = scmp.lt.s32.totalorder (!%p293_p2), %s1814_s10, 1 }
   0x6   : > { %296 = sbr.rel (%p293_p2) target bundleno = 369 (0x171), region = 48 }
   0xb   : > { %v2065_v0 = vld [vmem:[%s2867_s1 + $0x74] ss:$8 sps:$4 sm:$0xff]   ;;  %v2069_v2 = vld [vmem:[%s2867_s1 + $0x70] ss:$8 sps:$4 sm:$0xff]   ;;  %v2071_v4 = vld [vmem:[%s2867_s1 + $0x64] ss:$8 sps:$4 sm:$0xff]  }
   0xc   : > { %v2067_v1 = vld [vmem:[%s2868_s2 + $0x74] ss:$8 sps:$4 sm:$0xff]   ;;  %610 = vmatprep.subr.bf16.mxu0 %v2065_v0  ;;  %v2070_v3 = vld [vmem:[%s2868_s2 + $0x70] ss:$8 sps:$4 sm:$0xff]   ;;  %v2073_v5 = vld [vmem:[%s2868_s2 + $0x64] ss:$8 sps:$4 sm:$0xff]  }
   0xd   : > { %1039 = vmatprep.subr.bf16.mxu1 %v2067_v1  ;;  %611 = vmatpush1.bf16.msra.mxu0 %v2069_v2  ;;  %v2075_v6 = vld [vmem:[%s2867_s1 + $0x60] ss:$8 sps:$4 sm:$0xff]   ;;  %v2077_v8 = vld [vmem:[%s2867_s1 + $0x54] ss:$8 sps:$4 sm:$0xff]   ;;  %v2081_v10 = vld [vmem:[%s2867_s1 + $0x50] ss:$8 sps:$4 sm:$0xff]  }
   0xe   : > { %1040 = vmatpush1.bf16.msra.mxu1 %v2070_v3  ;;  %612 = vmatprep.subr.bf16.mxu0 %v2071_v4  ;;  %v2076_v7 = vld [vmem:[%s2868_s2 + $0x60] ss:$8 sps:$4 sm:$0xff]   ;;  %v2079_v9 = vld [vmem:[%s2868_s2 + $0x54] ss:$8 sps:$4 sm:$0xff]   ;;  %v2082_v11 = vld [vmem:[%s2868_s2 + $0x50] ss:$8 sps:$4 sm:$0xff]  }
   0xf   : > { %1041 = vmatprep.subr.bf16.mxu1 %v2073_v5  ;;  %v2083_v12 = vld [vmem:[%s2867_s1 + $0x44] ss:$8 sps:$4 sm:$0xff]   ;;  %v2087_v14 = vld [vmem:[%s2867_s1 + $0x40] ss:$8 sps:$4 sm:$0xff]   ;;  %v2089_v16 = vld [vmem:[%s2867_s1 + $0x34] ss:$8 sps:$4 sm:$0xff]  }
  0x10   : > { %v2085_v13 = vld [vmem:[%s2868_s2 + $0x44] ss:$8 sps:$4 sm:$0xff]   ;;  %v2088_v15 = vld [vmem:[%s2868_s2 + $0x40] ss:$8 sps:$4 sm:$0xff]   ;;  %v2091_v17 = vld [vmem:[%s2868_s2 + $0x34] ss:$8 sps:$4 sm:$0xff]  }
  0x11   : > { %613 = vmatpush1.bf16.msra.mxu0 %v2075_v6  ;;  %v2093_v18 = vld [vmem:[%s2867_s1 + $0x30] ss:$8 sps:$4 sm:$0xff]   ;;  %v2095_v20 = vld [vmem:[%s2867_s1 + $0x24] ss:$8 sps:$4 sm:$0xff]   ;;  %v2099_v22 = vld [vmem:[%s2867_s1 + $0x20] ss:$8 sps:$4 sm:$0xff]  }
  0x12   : > { %1042 = vmatpush1.bf16.msra.mxu1 %v2076_v7  ;;  %614 = vmatprep.subr.bf16.mxu0 %v2077_v8  ;;  %v2094_v19 = vld [vmem:[%s2868_s2 + $0x30] ss:$8 sps:$4 sm:$0xff]   ;;  %v2097_v21 = vld [vmem:[%s2868_s2 + $0x24] ss:$8 sps:$4 sm:$0xff]   ;;  %v2100_v23 = vld [vmem:[%s2868_s2 + $0x20] ss:$8 sps:$4 sm:$0xff]  }
  0x13   : > { %1043 = vmatprep.subr.bf16.mxu1 %v2079_v9  ;;  %v2101_v24 = vld [vmem:[%s2867_s1 + $0x14] ss:$8 sps:$4 sm:$0xff]   ;;  %v2105_v26 = vld [vmem:[%s2867_s1 + $0x10] ss:$8 sps:$4 sm:$0xff]   ;;  %v2107_v28 = vld [vmem:[%s2867_s1 + $0x4] ss:$8 sps:$4 sm:$0xff]  }
  0x14   : > { %v2103_v25 = vld [vmem:[%s2868_s2 + $0x14] ss:$8 sps:$4 sm:$0xff]   ;;  %v2106_v27 = vld [vmem:[%s2868_s2 + $0x10] ss:$8 sps:$4 sm:$0xff]   ;;  %v2109_v29 = vld [vmem:[%s2868_s2 + $0x4] ss:$8 sps:$4 sm:$0xff]  }
  0x15   : > { %615 = vmatpush1.bf16.msra.mxu0 %v2081_v10  ;;  %v2111_v30 = vld [vmem:[%s2867_s1] ss:$8 sps:$4 sm:$0xff]   ;;  %v2113_v32 = vld [vmem:[%s2867_s1 + $0xf4] ss:$8 sps:$4 sm:$0xff]   ;;  %v2117_v34 = vld [vmem:[%s2867_s1 + $0xf0] ss:$8 sps:$4 sm:$0xff]  }
  0x16   : > { %1044 = vmatpush1.bf16.msra.mxu1 %v2082_v11  ;;  %616 = vmatprep.subr.bf16.mxu0 %v2083_v12  ;;  %v2112_v31 = vld [vmem:[%s2868_s2] ss:$8 sps:$4 sm:$0xff]   ;;  %v2115_v33 = vld [vmem:[%s2868_s2 + $0xf4] ss:$8 sps:$4 sm:$0xff]   ;;  %v2118_v35 = vld [vmem:[%s2868_s2 + $0xf0] ss:$8 sps:$4 sm:$0xff]  }
  0x17   : > { %1045 = vmatprep.subr.bf16.mxu1 %v2085_v13  ;;  %v2119_v36 = vld [vmem:[%s2867_s1 + $0xe4] ss:$8 sps:$4 sm:$0xff]   ;;  %s2877_s10 = smov (!%p338_p3, %s1814_s10), 1  ;;  %v2123_v38 = vld [vmem:[%s2867_s1 + $0xe0] ss:$8 sps:$4 sm:$0xff]  }
  0x18   : > { %v2121_v37 = vld [vmem:[%s2868_s2 + $0xe4] ss:$8 sps:$4 sm:$0xff]   ;;  %v2124_v39 = vld [vmem:[%s2868_s2 + $0xe0] ss:$8 sps:$4 sm:$0xff]   ;;  %v2125_v40 = vld [vmem:[%s2867_s1 + $0xd4] ss:$8 sps:$4 sm:$0xff]  }
  0x19   : > { %617 = vmatpush1.bf16.msra.mxu0 %v2087_v14  ;;  %s1973_s17 = sshll.u32 %s2877_s10, 8  ;;  %v2127_v41 = vld [vmem:[%s2868_s2 + $0xd4] ss:$8 sps:$4 sm:$0xff]   ;;  %v2129_v42 = vld [vmem:[%s2867_s1 + $0xd0] ss:$8 sps:$4 sm:$0xff]   ;;  %s2690_s25 = sshll.u32 %s2877_s10, 7 }
  0x1a   : > { %1046 = vmatpush1.bf16.msra.mxu1 %v2088_v15  ;;  %618 = vmatprep.subr.bf16.mxu0 %v2089_v16  ;;  %v2130_v43 = vld [vmem:[%s2868_s2 + $0xd0] ss:$8 sps:$4 sm:$0xff]   ;;  %s2417_s26 = scalar_lea.vmem %s2866_s0, %s1973_s17  ;;  %v2131_v44 = vld [vmem:[%s2867_s1 + $0xc4] ss:$8 sps:$4 sm:$0xff]   ;;  %v2135_v47 = vld [vmem:[%s2867_s1 + $0xc0] ss:$8 sps:$4 sm:$0xff]   ;;  %s2700_s29 = scalar_lea.vmem %s2873_s7, %s2690_s25 }
  0x1b   : > { %1047 = vmatprep.subr.bf16.mxu1 %v2091_v17  ;;  %v2133_v45 = vld [vmem:[%s2868_s2 + $0xc4] ss:$8 sps:$4 sm:$0xff]   ;;  %v2136_v48 = vld [vmem:[%s2868_s2 + $0xc0] ss:$8 sps:$4 sm:$0xff]   ;;  %v361_v49 = vld [vmem:[%s2417_s26 + $0x18] sm:$0xff]  ;;  %s2706_s12 = scalar_lea.vmem %s2874_s8, %s2690_s25  ;;  %s2817_s17 = scalar_lea.vmem %s2875_s9, %s2690_s25 }
  0x1c   : > { %v359_v46 = vld [vmem:[%s2417_s26 + $0x8] sm:$0xff]  ;;  %v2137_v50 = vld [vmem:[%s2867_s1 + $0xb4] ss:$8 sps:$4 sm:$0xff]   ;;  %v2141_v53 = vld [vmem:[%s2867_s1 + $0xb0] ss:$8 sps:$4 sm:$0xff]  }
  0x1d   : > { %619 = vmatpush1.bf16.msra.mxu0 %v2093_v18  ;;  %v2436_v51 = vpack.c.bf16 %v361_v49, %v359_v46  ;;  %v2139_v52 = vld [vmem:[%s2868_s2 + $0xb4] ss:$8 sps:$4 sm:$0xff]   ;;  %v2142_v54 = vld [vmem:[%s2868_s2 + $0xb0] ss:$8 sps:$4 sm:$0xff]   ;;  %v2143_v55 = vld [vmem:[%s2867_s1 + $0xa4] ss:$8 sps:$4 sm:$0xff]  }
  0x1e   : > { %1048 = vmatpush1.bf16.msra.mxu1 %v2094_v19  ;;  %620 = vmatprep.subr.bf16.mxu0 %v2095_v20  ;;  %v2145_v56 = vld [vmem:[%s2868_s2 + $0xa4] ss:$8 sps:$4 sm:$0xff]   ;;  %v2147_v57 = vld [vmem:[%s2867_s1 + $0xa0] ss:$8 sps:$4 sm:$0xff]   ;;  %v2149_v59 = vld [vmem:[%s2867_s1 + $0x94] ss:$8 sps:$4 sm:$0xff]  }
  0x1f   : > { %1049 = vmatprep.subr.bf16.mxu1 %v2097_v21  ;;  %642 = vmatprep.mubr.bf16.mxu0 %v2436_v51  ;;  %v2148_v58 = vld [vmem:[%s2868_s2 + $0xa0] ss:$8 sps:$4 sm:$0xff]   ;;  %v2151_v60 = vld [vmem:[%s2868_s2 + $0x94] ss:$8 sps:$4 sm:$0xff]   ;;  %v2153_v61 = vld [vmem:[%s2867_s1 + $0x90] ss:$8 sps:$4 sm:$0xff]  }
  0x20   : > { %1071 = vmatprep.mubr.bf16.mxu1 %v2436_v51  ;;  %v2154_v62 = vld [vmem:[%s2868_s2 + $0x90] ss:$8 sps:$4 sm:$0xff]   ;;  %v2155_v63 = vld [vmem:[%s2867_s1 + $0x84] ss:$8 sps:$4 sm:$0xff]   ;;  %v2159_v1 = vld [vmem:[%s2867_s1 + $0x80] ss:$8 sps:$4 sm:$0xff]  }
  0x21   : > { %621 = vmatpush1.bf16.msra.mxu0 %v2099_v22  ;;  %v2157_v0 = vld [vmem:[%s2868_s2 + $0x84] ss:$8 sps:$4 sm:$0xff]   ;;  %v2160_v2 = vld [vmem:[%s2868_s2 + $0x80] ss:$8 sps:$4 sm:$0xff]   ;;  %v360_v4 = vld [vmem:[%s2417_s26 + $0x10] sm:$0xff] }
  0x22   : > { %1050 = vmatpush1.bf16.msra.mxu1 %v2100_v23  ;;  %622 = vmatprep.subr.bf16.mxu0 %v2101_v24  ;;  %v358_v3 = vld [vmem:[%s2417_s26] sm:$0xff]  ;;  %v2163_v5 = vld [vmem:[%s2869_s3 + $0x74] ss:$8 sps:$4 sm:$0xff]   ;;  %v363_v7 = vld [vmem:[%s2417_s26 + $0x28] sm:$0xff] }
  0x23   : > { %1051 = vmatprep.subr.bf16.mxu1 %v2103_v25  ;;  %v2490_v6 = vpack.c.bf16 %v360_v4, %v358_v3  ;;  %v365_v8 = vld [vmem:[%s2417_s26 + $0x38] sm:$0xff]  ;;  %v2166_v10 = vld [vmem:[%s2869_s3 + $0x64] ss:$8 sps:$4 sm:$0xff]   ;;  %v2164_v12 = vld [vmem:[%s2869_s3 + $0x60] ss:$8 sps:$4 sm:$0xff]  }
  0x24   : > { %v2161_v9 = vld [vmem:[%s2869_s3 + $0x70] ss:$8 sps:$4 sm:$0xff]   ;;  %v2500_v11 = vpack.c.bf16 %v365_v8, %v363_v7  ;;  %v362_v13 = vld [vmem:[%s2417_s26 + $0x20] sm:$0xff]  ;;  %v2169_v15 = vld [vmem:[%s2869_s3 + $0x54] ss:$8 sps:$4 sm:$0xff]  }
  0x25   : > { %623 = vmatpush1.bf16.msra.mxu0 %v2105_v26  ;;  %v364_v14 = vld [vmem:[%s2417_s26 + $0x30] sm:$0xff]  ;;  %v367_v17 = vld [vmem:[%s2417_s26 + $0x48] sm:$0xff]  ;;  %v369_v18 = vld [vmem:[%s2417_s26 + $0x58] sm:$0xff] }
  0x26   : > { %1052 = vmatpush1.bf16.msra.mxu1 %v2106_v27  ;;  %624 = vmatprep.subr.bf16.mxu0 %v2107_v28  ;;  %v2514_v16 = vpack.c.bf16 %v364_v14, %v362_v13  ;;  %v2167_v19 = vld [vmem:[%s2869_s3 + $0x50] ss:$8 sps:$4 sm:$0xff]   ;;  %v2172_v20 = vld [vmem:[%s2869_s3 + $0x44] ss:$8 sps:$4 sm:$0xff]   ;;  %v2524_v21 = vpack.c.bf16 %v369_v18, %v367_v17  ;;  %v2170_v22 = vld [vmem:[%s2869_s3 + $0x40] ss:$8 sps:$4 sm:$0xff]  }
  0x27   : > { %1053 = vmatprep.subr.bf16.mxu1 %v2109_v29  ;;  %v366_v23 = vld [vmem:[%s2417_s26 + $0x40] sm:$0xff]  ;;  %v368_v24 = vld [vmem:[%s2417_s26 + $0x50] sm:$0xff]  ;;  %v371_v27 = vld [vmem:[%s2417_s26 + $0x68] sm:$0xff] }
  0x28   : > { %v2175_v25 = vld [vmem:[%s2869_s3 + $0x34] ss:$8 sps:$4 sm:$0xff]   ;;  %v2538_v26 = vpack.c.bf16 %v368_v24, %v366_v23  ;;  %v2173_v29 = vld [vmem:[%s2869_s3 + $0x30] ss:$8 sps:$4 sm:$0xff]   ;;  %v387_v4 = vld [vmem:[%s2417_s26 + $0xe8] sm:$0xff] }
  0x29   : > { %625 = vmatpush1.bf16.msra.mxu0 %v2111_v30  ;;  %v373_v28 = vld [vmem:[%s2417_s26 + $0x78] sm:$0xff]  ;;  %v2178_v30 = vld [vmem:[%s2869_s3 + $0x24] ss:$8 sps:$4 sm:$0xff]   ;;  %v388_v13 = vld [vmem:[%s2417_s26 + $0xf0] sm:$0xff] }
  0x2a   : > { %1054 = vmatpush1.bf16.msra.mxu1 %v2112_v31  ;;  %626 = vmatprep.subr.bf16.mxu0 %v2113_v32  ;;  %v2548_v31 = vpack.c.bf16 %v373_v28, %v371_v27  ;;  %v2176_v32 = vld [vmem:[%s2869_s3 + $0x20] ss:$8 sps:$4 sm:$0xff]   ;;  %v2185_v49 = vld [vmem:[%s2869_s3 + $0xf0] ss:$8 sps:$4 sm:$0xff]   ;;  %v2202_v8 = vld [vmem:[%s2869_s3 + $0xa4] ss:$8 sps:$4 sm:$0xff]  }
  0x2b   : > { %1055 = vmatprep.subr.bf16.mxu1 %v2115_v33  ;;  %v370_v33 = vld [vmem:[%s2417_s26 + $0x60] sm:$0xff]  ;;  %v2197_v7 = vld [vmem:[%s2869_s3 + $0xb0] ss:$8 sps:$4 sm:$0xff]   ;;  %v2205_v14 = vld [vmem:[%s2869_s3 + $0x94] ss:$8 sps:$4 sm:$0xff]  }
  0x2c   : > { %v2203_v17 = vld [vmem:[%s2869_s3 + $0x90] ss:$8 sps:$4 sm:$0xff]   ;;  %v2208_v18 = vld [vmem:[%s2869_s3 + $0x84] ss:$8 sps:$4 sm:$0xff]  }
  0x2d   : > { %627 = vmatpush2.bf16.msra.mxu0 %v2117_v34  ;;  %v372_v34 = vld [vmem:[%s2417_s26 + $0x70] sm:$0xff] }
  0x2e   : > { %1056 = vmatpush2.bf16.msra.mxu1 %v2118_v35  ;;  %628 = vmatprep.subr.bf16.mxu0 %v2119_v36  ;;  %v2181_v35 = vld [vmem:[%s2869_s3 + $0x14] ss:$8 sps:$4 sm:$0xff]   ;;  %v2562_v36 = vpack.c.bf16 %v372_v34, %v370_v33 }
  0x2f   : > { %1057 = vmatprep.subr.bf16.mxu1 %v2121_v37  ;;  %v375_v37 = vld [vmem:[%s2417_s26 + $0x88] sm:$0xff] }
  0x31   : > { %629 = vmatpush2.bf16.msra.mxu0 %v2123_v38  ;;  %v377_v38 = vld [vmem:[%s2417_s26 + $0x98] sm:$0xff] }
  0x32   : > { %1058 = vmatpush2.bf16.msra.mxu1 %v2124_v39  ;;  %630 = vmatprep.subr.bf16.mxu0 %v2125_v40  ;;  %v2179_v39 = vld [vmem:[%s2869_s3 + $0x10] ss:$8 sps:$4 sm:$0xff]   ;;  %v2184_v40 = vld [vmem:[%s2869_s3 + $0x4] ss:$8 sps:$4 sm:$0xff]  }
  0x33   : > { %1059 = vmatprep.subr.bf16.mxu1 %v2127_v41  ;;  %v2572_v41 = vpack.c.bf16 %v377_v38, %v375_v37 }
  0x35   : > { %631 = vmatpush2.bf16.msra.mxu0 %v2129_v42  ;;  %v2182_v42 = vld [vmem:[%s2869_s3] ss:$8 sps:$4 sm:$0xff]  }
  0x36   : > { %1060 = vmatpush2.bf16.msra.mxu1 %v2130_v43  ;;  %632 = vmatprep.subr.bf16.mxu0 %v2131_v44  ;;  %v374_v43 = vld [vmem:[%s2417_s26 + $0x80] sm:$0xff]  ;;  %v376_v44 = vld [vmem:[%s2417_s26 + $0x90] sm:$0xff] }
  0x37   : > { %1061 = vmatprep.subr.bf16.mxu1 %v2133_v45  ;;  %v2187_v45 = vld [vmem:[%s2869_s3 + $0xf4] ss:$8 sps:$4 sm:$0xff]   ;;  %v2586_v46 = vpack.c.bf16 %v376_v44, %v374_v43 }
  0x39   : > { %633 = vmatpush2.bf16.msra.mxu0 %v2135_v47  ;;  %v379_v47 = vld [vmem:[%s2417_s26 + $0xa8] sm:$0xff] }
  0x3a   : > { %1062 = vmatpush2.bf16.msra.mxu1 %v2136_v48  ;;  %634 = vmatprep.subr.bf16.mxu0 %v2137_v50  ;;  %v381_v48 = vld [vmem:[%s2417_s26 + $0xb8] sm:$0xff]  ;;  %v2190_v50 = vld [vmem:[%s2869_s3 + $0xe4] ss:$8 sps:$4 sm:$0xff]  }
  0x3b   : > { %1063 = vmatprep.subr.bf16.mxu1 %v2139_v52  ;;  %v2596_v52 = vpack.c.bf16 %v381_v48, %v379_v47 }
  0x3d   : > { %635 = vmatpush2.bf16.msra.mxu0 %v2141_v53  ;;  %v2188_v53 = vld [vmem:[%s2869_s3 + $0xe0] ss:$8 sps:$4 sm:$0xff]  }
  0x3e   : > { %1064 = vmatpush2.bf16.msra.mxu1 %v2142_v54  ;;  %636 = vmatprep.subr.bf16.mxu0 %v2143_v55  ;;  %v378_v54 = vld [vmem:[%s2417_s26 + $0xa0] sm:$0xff]  ;;  %v380_v55 = vld [vmem:[%s2417_s26 + $0xb0] sm:$0xff] }
  0x3f   : > { %1065 = vmatprep.subr.bf16.mxu1 %v2145_v56  ;;  %v2193_v56 = vld [vmem:[%s2869_s3 + $0xd4] ss:$8 sps:$4 sm:$0xff]  }
  0x41   : > { %637 = vmatpush2.bf16.msra.mxu0 %v2147_v57  ;;  %v2610_v57 = vpack.c.bf16 %v380_v55, %v378_v54 }
  0x42   : > { %1066 = vmatpush2.bf16.msra.mxu1 %v2148_v58  ;;  %638 = vmatprep.subr.bf16.mxu0 %v2149_v59  ;;  %v383_v58 = vld [vmem:[%s2417_s26 + $0xc8] sm:$0xff]  ;;  %v385_v59 = vld [vmem:[%s2417_s26 + $0xd8] sm:$0xff] }
  0x43   : > { %1067 = vmatprep.subr.bf16.mxu1 %v2151_v60  ;;  %v2191_v60 = vld [vmem:[%s2869_s3 + $0xd0] ss:$8 sps:$4 sm:$0xff]  }
  0x45   : > { %639 = vmatpush2.bf16.msra.mxu0 %v2153_v61  ;;  %v2196_v61 = vld [vmem:[%s2869_s3 + $0xc4] ss:$8 sps:$4 sm:$0xff]  }
  0x46   : > { %1068 = vmatpush2.bf16.msra.mxu1 %v2154_v62  ;;  %640 = vmatprep.subr.bf16.mxu0 %v2155_v63  ;;  %v403_v62 = vpack.c.bf16 %v385_v59, %v383_v58  ;;  %v2194_v63 = vld [vmem:[%s2869_s3 + $0xc0] ss:$8 sps:$4 sm:$0xff]  }
  0x47   : > { %1069 = vmatprep.subr.bf16.mxu1 %v2157_v0  ;;  %v382_v0 = vld [vmem:[%s2417_s26 + $0xc0] sm:$0xff] }
  0x49   : > { %641 = vmatpush2.bf16.msra.mxu0 %v2159_v1  ;;  %v384_v1 = vld [vmem:[%s2417_s26 + $0xd0] sm:$0xff] }
  0x4a   : > { %1070 = vmatpush2.bf16.msra.mxu1 %v2160_v2  ;;  %1468 = vmatprep.subr.bf16.mxu0 %v2163_v5  ;;  %v2199_v2 = vld [vmem:[%s2869_s3 + $0xb4] ss:$8 sps:$4 sm:$0xff]   ;;  %v402_v3 = vpack.c.bf16 %v384_v1, %v382_v0 }
  0x4b   : > { %2025 = vmatprep.subr.bf16.mxu1 %v2163_v5  ;;  %v389_v5 = vld [vmem:[%s2417_s26 + $0xf8] sm:$0xff] }
  0x4c   : > { %643 = vmatmul.mubr.bf16.vlgmr.msra.gmra.mxu0 %v2490_v6 }
  0x4d   : > { %1072 = vmatmul.mubr.bf16.vlgmr.msra.gmra.mxu1 %v2490_v6  ;;  %1469 = vmatpush1.bf16.msra.mxu0 %v2161_v9 }
  0x4e   : > { %2041 = vmatpush1.bf16.msra.mxu1 %v2161_v9  ;;  %1470 = vmatprep.subr.bf16.mxu0 %v2166_v10  ;;  %v405_v9 = vpack.c.bf16 %v389_v5, %v387_v4 }
  0x4f   : > { %2026 = vmatprep.subr.bf16.mxu1 %v2166_v10  ;;  %652 = vmatprep.mubr.bf16.mxu0 %v2500_v11  ;;  %v2200_v10 = vld [vmem:[%s2869_s3 + $0xa0] ss:$8 sps:$4 sm:$0xff]  }
  0x50   : > { %1081 = vmatprep.mubr.bf16.mxu1 %v2500_v11 }
  0x51   : > { %1471 = vmatpush1.bf16.msra.mxu0 %v2164_v12 }
  0x52   : > { %2042 = vmatpush1.bf16.msra.mxu1 %v2164_v12  ;;  %1472 = vmatprep.subr.bf16.mxu0 %v2169_v15  ;;  %v386_v12 = vld [vmem:[%s2417_s26 + $0xe0] sm:$0xff] }
  0x53   : > { %2027 = vmatprep.subr.bf16.mxu1 %v2169_v15  ;;  %v404_v15 = vpack.c.bf16 %v388_v13, %v386_v12 }
  0x54   : > { %653 = vmatmul.mubr.bf16.gmra.mxu0 %v2514_v16 }
  0x55   : > { %1082 = vmatmul.mubr.bf16.gmra.mxu1 %v2514_v16  ;;  %1473 = vmatpush1.bf16.msra.mxu0 %v2167_v19 }
  0x56   : > { %2043 = vmatpush1.bf16.msra.mxu1 %v2167_v19  ;;  %1474 = vmatprep.subr.bf16.mxu0 %v2172_v20  ;;  %v2206_v19 = vld [vmem:[%s2869_s3 + $0x80] ss:$8 sps:$4 sm:$0xff]  }
  0x57   : > { %2028 = vmatprep.subr.bf16.mxu1 %v2172_v20  ;;  %662 = vmatprep.mubr.bf16.mxu0 %v2524_v21  ;;  %v438_v20 = vld [vmem:[%s2870_s4] sm:$0x3] }
  0x58   : > { %1091 = vmatprep.mubr.bf16.mxu1 %v2524_v21 }
  0x59   : > { %1475 = vmatpush1.bf16.msra.mxu0 %v2170_v22 }
  0x5a   : > { %2044 = vmatpush1.bf16.msra.mxu1 %v2170_v22  ;;  %1476 = vmatprep.subr.bf16.mxu0 %v2175_v25 }
  0x5b   : > { %2029 = vmatprep.subr.bf16.mxu1 %v2175_v25 }
  0x5c   : > { %663 = vmatmul.mubr.bf16.gmra.mxu0 %v2538_v26 }
  0x5d   : > { %1092 = vmatmul.mubr.bf16.gmra.mxu1 %v2538_v26  ;;  %1477 = vmatpush1.bf16.msra.mxu0 %v2173_v29 }
  0x5e   : > { %2045 = vmatpush1.bf16.msra.mxu1 %v2173_v29  ;;  %1478 = vmatprep.subr.bf16.mxu0 %v2178_v30 }
  0x5f   : > { %2030 = vmatprep.subr.bf16.mxu1 %v2178_v30  ;;  %672 = vmatprep.mubr.bf16.mxu0 %v2548_v31 }
  0x60   : > { %1101 = vmatprep.mubr.bf16.mxu1 %v2548_v31 }
  0x61   : > { %1479 = vmatpush1.bf16.msra.mxu0 %v2176_v32 }
  0x62   : > { %2046 = vmatpush1.bf16.msra.mxu1 %v2176_v32  ;;  %1480 = vmatprep.subr.bf16.mxu0 %v2181_v35 }
  0x63   : > { %2031 = vmatprep.subr.bf16.mxu1 %v2181_v35 }
  0x64   : > { %673 = vmatmul.mubr.bf16.gmra.mxu0 %v2562_v36 }
  0x65   : > { %1102 = vmatmul.mubr.bf16.gmra.mxu1 %v2562_v36  ;;  %1481 = vmatpush1.bf16.msra.mxu0 %v2179_v39 }
  0x66   : > { %2047 = vmatpush1.bf16.msra.mxu1 %v2179_v39  ;;  %1482 = vmatprep.subr.bf16.mxu0 %v2184_v40 }
  0x67   : > { %2032 = vmatprep.subr.bf16.mxu1 %v2184_v40  ;;  %682 = vmatprep.mubr.bf16.mxu0 %v2572_v41 }
  0x68   : > { %1111 = vmatprep.mubr.bf16.mxu1 %v2572_v41 }
  0x69   : > { %1483 = vmatpush1.bf16.msra.mxu0 %v2182_v42 }
  0x6a   : > { %2048 = vmatpush1.bf16.msra.mxu1 %v2182_v42  ;;  %1484 = vmatprep.subr.bf16.mxu0 %v2187_v45 }
  0x6b   : > { %2033 = vmatprep.subr.bf16.mxu1 %v2187_v45 }
  0x6c   : > { %683 = vmatmul.mubr.bf16.gmra.mxu0 %v2586_v46 }
  0x6d   : > { %1112 = vmatmul.mubr.bf16.gmra.mxu1 %v2586_v46  ;;  %1485 = vmatpush2.bf16.msra.mxu0 %v2185_v49 }
  0x6e   : > { %2049 = vmatpush2.bf16.msra.mxu1 %v2185_v49  ;;  %1486 = vmatprep.subr.bf16.mxu0 %v2190_v50 }
  0x6f   : > { %2034 = vmatprep.subr.bf16.mxu1 %v2190_v50  ;;  %692 = vmatprep.mubr.bf16.mxu0 %v2596_v52 }
  0x70   : > { %1121 = vmatprep.mubr.bf16.mxu1 %v2596_v52 }
  0x71   : > { %1487 = vmatpush2.bf16.msra.mxu0 %v2188_v53 }
  0x72   : > { %2050 = vmatpush2.bf16.msra.mxu1 %v2188_v53  ;;  %1488 = vmatprep.subr.bf16.mxu0 %v2193_v56 }
  0x73   : > { %2035 = vmatprep.subr.bf16.mxu1 %v2193_v56 }
  0x74   : > { %693 = vmatmul.mubr.bf16.gmra.mxu0 %v2610_v57 }
  0x75   : > { %1122 = vmatmul.mubr.bf16.gmra.mxu1 %v2610_v57  ;;  %1489 = vmatpush2.bf16.msra.mxu0 %v2191_v60 }
  0x76   : > { %2051 = vmatpush2.bf16.msra.mxu1 %v2191_v60  ;;  %1490 = vmatprep.subr.bf16.mxu0 %v2196_v61 }
  0x77   : > { %2036 = vmatprep.subr.bf16.mxu1 %v2196_v61  ;;  %702 = vmatprep.mubr.bf16.mxu0 %v403_v62 }
  0x78   : > { %1131 = vmatprep.mubr.bf16.mxu1 %v403_v62 }
  0x79   : > { %1491 = vmatpush2.bf16.msra.mxu0 %v2194_v63 }
  0x7a   : > { %2052 = vmatpush2.bf16.msra.mxu1 %v2194_v63  ;;  %1492 = vmatprep.subr.bf16.mxu0 %v2199_v2 }
  0x7b   : > { %2037 = vmatprep.subr.bf16.mxu1 %v2199_v2 }
  0x7c   : > { %703 = vmatmul.mubr.bf16.gmra.mxu0 %v402_v3 }
  0x7d   : > { %1132 = vmatmul.mubr.bf16.gmra.mxu1 %v402_v3  ;;  %1493 = vmatpush2.bf16.msra.mxu0 %v2197_v7 }
  0x7e   : > { %2053 = vmatpush2.bf16.msra.mxu1 %v2197_v7  ;;  %1494 = vmatprep.subr.bf16.mxu0 %v2202_v8 }
  0x7f   : > { %2038 = vmatprep.subr.bf16.mxu1 %v2202_v8  ;;  %712 = vmatprep.mubr.bf16.mxu0 %v405_v9 }
  0x80   : > { %1141 = vmatprep.mubr.bf16.mxu1 %v405_v9 }
  0x81   : > { %1495 = vmatpush2.bf16.msra.mxu0 %v2200_v10 }
  0x82   : > { %2054 = vmatpush2.bf16.msra.mxu1 %v2200_v10  ;;  %1496 = vmatprep.subr.bf16.mxu0 %v2205_v14 }
  0x83   : > { %2039 = vmatprep.subr.bf16.mxu1 %v2205_v14 }
  0x84   : > { %713 = vmatmul.mubr.bf16.gmra.mxu0 %v404_v15 }
  0x85   : > { %1142 = vmatmul.mubr.bf16.gmra.mxu1 %v404_v15  ;;  %1497 = vmatpush2.bf16.msra.mxu0 %v2203_v17 }
  0x86   : > { %2055 = vmatpush2.bf16.msra.mxu1 %v2203_v17  ;;  %1498 = vmatprep.subr.bf16.mxu0 %v2208_v18 }
  0x87   : > { %2040 = vmatprep.subr.bf16.mxu1 %v2208_v18  ;;  %1500 = vmatprep.mubr.bf16.mxu0 %v2436_v51  ;;  %v440_v51 = vlaneseq }
  0x88   : > { %1540 = vmatprep.mubr.bf16.mxu1 %v2572_v41 }
  0x89   : > { %1499 = vmatpush2.bf16.msra.mxu0 %v2206_v19 }
  0x8a   : > { %2056 = vmatpush2.bf16.msra.mxu1 %v2206_v19 }
  0x8c   : > { %1501 = vmatmul.mubr.bf16.vlgmr.msra.gmra.mxu0 %v2490_v6  ;;  %v441_v6 = vshrl.u32 %v440_v51, 7 }
  0x8d   : > { %1541 = vmatmul.mubr.bf16.vlgmr.msra.gmra.mxu1 %v2586_v46  ;;  %1510 = vmatprep.mubr.bf16.mxu0 %v2500_v11 }
  0x8e   : > { %1550 = vmatprep.mubr.bf16.mxu1 %v2596_v52  ;;  %v2667_v11 = vsub.s32 0, %v441_v6 }
  0x90   : > { %v2678_v22 = vrot.slane %v438_v20, %v2667_v11 }
  0x94   : > { %1511 = vmatmul.mubr.bf16.gmra.mxu0 %v2514_v16  ;;  %v2669_v16 = vsub.s32 1, %v441_v6 }
  0x95   : > { %1551 = vmatmul.mubr.bf16.gmra.mxu1 %v2610_v57  ;;  %1520 = vmatprep.mubr.bf16.mxu0 %v2524_v21  ;;  %v867_v21 = vld [vmem:[%s2871_s5] sm:$0x3] }
  0x96   : > { %1560 = vmatprep.mubr.bf16.mxu1 %v403_v62  ;;  %v2681_v23 = vrot.slane %v867_v21, %v2667_v11  ;;  %v2684_v24 = vrot.slane %v438_v20, %v2669_v16  ;;  %v2687_v25 = vrot.slane %v867_v21, %v2669_v16 }
  0x9c   : > { %1521 = vmatmul.mubr.bf16.gmra.mxu0 %v2538_v26 }
  0x9d   : > { %1561 = vmatmul.mubr.bf16.gmra.mxu1 %v402_v3  ;;  %1530 = vmatprep.mubr.bf16.mxu0 %v2548_v31 }
  0x9e   : > { %1570 = vmatprep.mubr.bf16.mxu1 %v405_v9 }
  0xa4   : > { %1531 = vmatmul.mubr.bf16.gmra.mxu0 %v2562_v36 }
  0xa5   : > { %1571 = vmatmul.mubr.bf16.gmra.mxu1 %v404_v15 }
 0x10c   : > { %v644_v26 = vpop.f32.mrf.mxu0 }
 0x10d   : > { %v1073_v27 = vpop.f32.mrf.mxu1  ;;  %v645_v30 = vadd.f32 %v644_v26, %v2678_v22 }
 0x10e   : > { %v646_v28 = vpop.f32.mrf.mxu0  ;;  %v1074_v31 = vadd.f32 %v1073_v27, %v2681_v23 }
 0x10f   : > { %v1075_v29 = vpop.f32.mrf.mxu1  ;;  %v647_v32 = vadd.f32 %v646_v28, %v2684_v24 }
 0x110   : > { %v1076_v33 = vadd.f32 %v1075_v29, %v2687_v25  ;;  %v648_v34 = vpop.f32.mrf.mxu0 }
 0x111   : > { %v1077_v35 = vpop.f32.mrf.mxu1  ;;  %v1977_v36 = vpack.c.bf16 %v647_v32, %v645_v30  ;;  %v649_v40 = vadd.f32 %v648_v34, %v2678_v22 }
 0x112   : > { %v1993_v37 = vpack.c.bf16 %v1076_v33, %v1074_v31  ;;  %v650_v38 = vpop.f32.mrf.mxu0  ;;  %v1078_v41 = vadd.f32 %v1077_v35, %v2681_v23 }
 0x113   : > { %v1079_v39 = vpop.f32.mrf.mxu1  ;;  %819 = vst [vmem:[%s2700_s29] sm:$0xff] %v1977_v36  ;;  %v651_v42 = vadd.f32 %v650_v38, %v2684_v24 }
 0x114   : > { %1248 = vst [vmem:[%s2706_s12] sm:$0xff] %v1993_v37  ;;  %v1080_v43 = vadd.f32 %v1079_v39, %v2687_v25  ;;  %v654_v44 = vpop.f32.mrf.mxu0 }
 0x115   : > { %v1083_v45 = vpop.f32.mrf.mxu1  ;;  %v1978_v46 = vpack.c.bf16 %v651_v42, %v649_v40  ;;  %v655_v50 = vadd.f32 %v654_v44, %v2678_v22 }
 0x116   : > { %v1994_v47 = vpack.c.bf16 %v1080_v43, %v1078_v41  ;;  %v656_v48 = vpop.f32.mrf.mxu0  ;;  %v1084_v52 = vadd.f32 %v1083_v45, %v2681_v23 }
 0x117   : > { %v1085_v49 = vpop.f32.mrf.mxu1  ;;  %820 = vst [vmem:[%s2700_s29 + $0x8] sm:$0xff] %v1978_v46  ;;  %v657_v53 = vadd.f32 %v656_v48, %v2684_v24 }
 0x118   : > { %1249 = vst [vmem:[%s2706_s12 + $0x8] sm:$0xff] %v1994_v47  ;;  %v1086_v54 = vadd.f32 %v1085_v49, %v2687_v25  ;;  %v658_v55 = vpop.f32.mrf.mxu0 }
 0x119   : > { %v1087_v56 = vpop.f32.mrf.mxu1  ;;  %v1979_v57 = vpack.c.bf16 %v657_v53, %v655_v50  ;;  %v659_v61 = vadd.f32 %v658_v55, %v2678_v22 }
 0x11a   : > { %v1995_v58 = vpack.c.bf16 %v1086_v54, %v1084_v52  ;;  %v660_v59 = vpop.f32.mrf.mxu0  ;;  %v1088_v62 = vadd.f32 %v1087_v56, %v2681_v23 }
 0x11b   : > { %v1089_v60 = vpop.f32.mrf.mxu1  ;;  %821 = vst [vmem:[%s2700_s29 + $0x10] sm:$0xff] %v1979_v57  ;;  %v661_v63 = vadd.f32 %v660_v59, %v2684_v24 }
 0x11c   : > { %1250 = vst [vmem:[%s2706_s12 + $0x10] sm:$0xff] %v1995_v58  ;;  %v1090_v0 = vadd.f32 %v1089_v60, %v2687_v25  ;;  %v664_v1 = vpop.f32.mrf.mxu0 }
 0x11d   : > { %v1093_v2 = vpop.f32.mrf.mxu1  ;;  %v1980_v3 = vpack.c.bf16 %v661_v63, %v659_v61  ;;  %v665_v8 = vadd.f32 %v664_v1, %v2678_v22 }
 0x11e   : > { %v1996_v4 = vpack.c.bf16 %v1090_v0, %v1088_v62  ;;  %v666_v5 = vpop.f32.mrf.mxu0  ;;  %v1094_v9 = vadd.f32 %v1093_v2, %v2681_v23 }
 0x11f   : > { %v1095_v7 = vpop.f32.mrf.mxu1  ;;  %822 = vst [vmem:[%s2700_s29 + $0x18] sm:$0xff] %v1980_v3  ;;  %v667_v10 = vadd.f32 %v666_v5, %v2684_v24 }
 0x120   : > { %1251 = vst [vmem:[%s2706_s12 + $0x18] sm:$0xff] %v1996_v4  ;;  %v1096_v12 = vadd.f32 %v1095_v7, %v2687_v25  ;;  %v668_v13 = vpop.f32.mrf.mxu0 }
 0x121   : > { %v1097_v14 = vpop.f32.mrf.mxu1  ;;  %v1981_v15 = vpack.c.bf16 %v667_v10, %v665_v8  ;;  %v669_v51 = vadd.f32 %v668_v13, %v2678_v22 }
 0x122   : > { %v1997_v17 = vpack.c.bf16 %v1096_v12, %v1094_v9  ;;  %v670_v18 = vpop.f32.mrf.mxu0  ;;  %v1098_v6 = vadd.f32 %v1097_v14, %v2681_v23 }
 0x123   : > { %v1099_v19 = vpop.f32.mrf.mxu1  ;;  %823 = vst [vmem:[%s2700_s29 + $0x20] sm:$0xff] %v1981_v15  ;;  %v671_v20 = vadd.f32 %v670_v18, %v2684_v24 }
 0x124   : > { %1252 = vst [vmem:[%s2706_s12 + $0x20] sm:$0xff] %v1997_v17  ;;  %v1100_v21 = vadd.f32 %v1099_v19, %v2687_v25  ;;  %v674_v26 = vpop.f32.mrf.mxu0 }
 0x125   : > { %v1103_v27 = vpop.f32.mrf.mxu1  ;;  %v1982_v28 = vpack.c.bf16 %v671_v20, %v669_v51  ;;  %v675_v32 = vadd.f32 %v674_v26, %v2678_v22 }
 0x126   : > { %v1998_v29 = vpack.c.bf16 %v1100_v21, %v1098_v6  ;;  %v676_v30 = vpop.f32.mrf.mxu0  ;;  %v1104_v33 = vadd.f32 %v1103_v27, %v2681_v23 }
 0x127   : > { %v1105_v31 = vpop.f32.mrf.mxu1  ;;  %824 = vst [vmem:[%s2700_s29 + $0x28] sm:$0xff] %v1982_v28  ;;  %v677_v34 = vadd.f32 %v676_v30, %v2684_v24 }
 0x128   : > { %1253 = vst [vmem:[%s2706_s12 + $0x28] sm:$0xff] %v1998_v29  ;;  %v1106_v35 = vadd.f32 %v1105_v31, %v2687_v25  ;;  %v678_v36 = vpop.f32.mrf.mxu0 }
 0x129   : > { %v1107_v37 = vpop.f32.mrf.mxu1  ;;  %v1983_v38 = vpack.c.bf16 %v677_v34, %v675_v32  ;;  %v679_v42 = vadd.f32 %v678_v36, %v2678_v22 }
 0x12a   : > { %v1999_v39 = vpack.c.bf16 %v1106_v35, %v1104_v33  ;;  %v680_v40 = vpop.f32.mrf.mxu0  ;;  %v1108_v43 = vadd.f32 %v1107_v37, %v2681_v23 }
 0x12b   : > { %v1109_v41 = vpop.f32.mrf.mxu1  ;;  %825 = vst [vmem:[%s2700_s29 + $0x30] sm:$0xff] %v1983_v38  ;;  %v681_v44 = vadd.f32 %v680_v40, %v2684_v24 }
 0x12c   : > { %1254 = vst [vmem:[%s2706_s12 + $0x30] sm:$0xff] %v1999_v39  ;;  %v1110_v45 = vadd.f32 %v1109_v41, %v2687_v25  ;;  %v684_v46 = vpop.f32.mrf.mxu0 }
 0x12d   : > { %v1113_v47 = vpop.f32.mrf.mxu1  ;;  %v1984_v48 = vpack.c.bf16 %v681_v44, %v679_v42  ;;  %v685_v53 = vadd.f32 %v684_v46, %v2678_v22 }
 0x12e   : > { %v2000_v49 = vpack.c.bf16 %v1110_v45, %v1108_v43  ;;  %v686_v50 = vpop.f32.mrf.mxu0  ;;  %v1114_v54 = vadd.f32 %v1113_v47, %v2681_v23 }
 0x12f   : > { %v1115_v52 = vpop.f32.mrf.mxu1  ;;  %826 = vst [vmem:[%s2700_s29 + $0x38] sm:$0xff] %v1984_v48  ;;  %v687_v55 = vadd.f32 %v686_v50, %v2684_v24 }
 0x130   : > { %1255 = vst [vmem:[%s2706_s12 + $0x38] sm:$0xff] %v2000_v49  ;;  %v1116_v56 = vadd.f32 %v1115_v52, %v2687_v25  ;;  %v688_v57 = vpop.f32.mrf.mxu0 }
 0x131   : > { %v1117_v58 = vpop.f32.mrf.mxu1  ;;  %v1985_v59 = vpack.c.bf16 %v687_v55, %v685_v53  ;;  %v689_v63 = vadd.f32 %v688_v57, %v2678_v22 }
 0x132   : > { %v2001_v60 = vpack.c.bf16 %v1116_v56, %v1114_v54  ;;  %v690_v61 = vpop.f32.mrf.mxu0  ;;  %v1118_v0 = vadd.f32 %v1117_v58, %v2681_v23 }
 0x133   : > { %v1119_v62 = vpop.f32.mrf.mxu1  ;;  %827 = vst [vmem:[%s2700_s29 + $0x40] sm:$0xff] %v1985_v59  ;;  %v691_v1 = vadd.f32 %v690_v61, %v2684_v24  ;;  %v1296_v59 = vld [vmem:[%s2872_s6] sm:$0x3] }
 0x134   : > { %1256 = vst [vmem:[%s2706_s12 + $0x40] sm:$0xff] %v2001_v60  ;;  %v1120_v2 = vadd.f32 %v1119_v62, %v2687_v25  ;;  %v694_v3 = vpop.f32.mrf.mxu0 }
 0x135   : > { %v1123_v4 = vpop.f32.mrf.mxu1  ;;  %v1986_v5 = vpack.c.bf16 %v691_v1, %v689_v63  ;;  %v695_v10 = vadd.f32 %v694_v3, %v2678_v22  ;;  %v2799_v3 = vrot.slane %v1296_v59, %v2669_v16 }
 0x136   : > { %v2002_v7 = vpack.c.bf16 %v1120_v2, %v1118_v0  ;;  %v696_v8 = vpop.f32.mrf.mxu0  ;;  %v1124_v12 = vadd.f32 %v1123_v4, %v2681_v23  ;;  %v2796_v2 = vrot.slane %v1296_v59, %v2667_v11 }
 0x137   : > { %v1125_v9 = vpop.f32.mrf.mxu1  ;;  %828 = vst [vmem:[%s2700_s29 + $0x48] sm:$0xff] %v1986_v5  ;;  %v697_v13 = vadd.f32 %v696_v8, %v2684_v24 }
 0x138   : > { %1257 = vst [vmem:[%s2706_s12 + $0x48] sm:$0xff] %v2002_v7  ;;  %v1126_v14 = vadd.f32 %v1125_v9, %v2687_v25  ;;  %v698_v15 = vpop.f32.mrf.mxu0 }
 0x139   : > { %v1127_v17 = vpop.f32.mrf.mxu1  ;;  %v1987_v18 = vpack.c.bf16 %v697_v13, %v695_v10  ;;  %v699_v20 = vadd.f32 %v698_v15, %v2678_v22 }
 0x13a   : > { %v2003_v19 = vpack.c.bf16 %v1126_v14, %v1124_v12  ;;  %v700_v51 = vpop.f32.mrf.mxu0  ;;  %v1128_v21 = vadd.f32 %v1127_v17, %v2681_v23 }
 0x13b   : > { %v1129_v6 = vpop.f32.mrf.mxu1  ;;  %829 = vst [vmem:[%s2700_s29 + $0x50] sm:$0xff] %v1987_v18  ;;  %v701_v26 = vadd.f32 %v700_v51, %v2684_v24 }
 0x13c   : > { %1258 = vst [vmem:[%s2706_s12 + $0x50] sm:$0xff] %v2003_v19  ;;  %v1130_v27 = vadd.f32 %v1129_v6, %v2687_v25  ;;  %v704_v28 = vpop.f32.mrf.mxu0 }
 0x13d   : > { %v1133_v29 = vpop.f32.mrf.mxu1  ;;  %v1988_v30 = vpack.c.bf16 %v701_v26, %v699_v20  ;;  %v705_v34 = vadd.f32 %v704_v28, %v2678_v22 }
 0x13e   : > { %v2004_v31 = vpack.c.bf16 %v1130_v27, %v1128_v21  ;;  %v706_v32 = vpop.f32.mrf.mxu0  ;;  %v1134_v35 = vadd.f32 %v1133_v29, %v2681_v23 }
 0x13f   : > { %v1135_v33 = vpop.f32.mrf.mxu1  ;;  %830 = vst [vmem:[%s2700_s29 + $0x58] sm:$0xff] %v1988_v30  ;;  %v707_v36 = vadd.f32 %v706_v32, %v2684_v24 }
 0x140   : > { %1259 = vst [vmem:[%s2706_s12 + $0x58] sm:$0xff] %v2004_v31  ;;  %v1136_v37 = vadd.f32 %v1135_v33, %v2687_v25  ;;  %v708_v38 = vpop.f32.mrf.mxu0 }
 0x141   : > { %v1137_v39 = vpop.f32.mrf.mxu1  ;;  %v1989_v40 = vpack.c.bf16 %v707_v36, %v705_v34  ;;  %v709_v44 = vadd.f32 %v708_v38, %v2678_v22 }
 0x142   : > { %v2005_v41 = vpack.c.bf16 %v1136_v37, %v1134_v35  ;;  %v710_v42 = vpop.f32.mrf.mxu0  ;;  %v1138_v45 = vadd.f32 %v1137_v39, %v2681_v23 }
 0x143   : > { %v1139_v43 = vpop.f32.mrf.mxu1  ;;  %831 = vst [vmem:[%s2700_s29 + $0x60] sm:$0xff] %v1989_v40  ;;  %v711_v46 = vadd.f32 %v710_v42, %v2684_v24 }
 0x144   : > { %1260 = vst [vmem:[%s2706_s12 + $0x60] sm:$0xff] %v2005_v41  ;;  %v1140_v47 = vadd.f32 %v1139_v43, %v2687_v25  ;;  %v714_v48 = vpop.f32.mrf.mxu0 }
 0x145   : > { %v1143_v49 = vpop.f32.mrf.mxu1  ;;  %v1990_v50 = vpack.c.bf16 %v711_v46, %v709_v44  ;;  %v715_v55 = vadd.f32 %v714_v48, %v2678_v22 }
 0x146   : > { %v2006_v52 = vpack.c.bf16 %v1140_v47, %v1138_v45  ;;  %v716_v53 = vpop.f32.mrf.mxu0  ;;  %v1144_v56 = vadd.f32 %v1143_v49, %v2681_v23 }
 0x147   : > { %v1145_v54 = vpop.f32.mrf.mxu1  ;;  %832 = vst [vmem:[%s2700_s29 + $0x68] sm:$0xff] %v1990_v50  ;;  %v717_v57 = vadd.f32 %v716_v53, %v2684_v24 }
 0x148   : > { %1261 = vst [vmem:[%s2706_s12 + $0x68] sm:$0xff] %v2006_v52  ;;  %v1146_v58 = vadd.f32 %v1145_v54, %v2687_v25  ;;  %v718_v60 = vpop.f32.mrf.mxu0 }
 0x149   : > { %v1147_v61 = vpop.f32.mrf.mxu1  ;;  %v1991_v62 = vpack.c.bf16 %v717_v57, %v715_v55  ;;  %v719_v4 = vadd.f32 %v718_v60, %v2678_v22 }
 0x14a   : > { %v2007_v63 = vpack.c.bf16 %v1146_v58, %v1144_v56  ;;  %v720_v0 = vpop.f32.mrf.mxu0  ;;  %v1148_v5 = vadd.f32 %v1147_v61, %v2681_v23 }
 0x14b   : > { %v1149_v1 = vpop.f32.mrf.mxu1  ;;  %833 = vst [vmem:[%s2700_s29 + $0x70] sm:$0xff] %v1991_v62  ;;  %v721_v7 = vadd.f32 %v720_v0, %v2684_v24 }
 0x14c   : > { %1262 = vst [vmem:[%s2706_s12 + $0x70] sm:$0xff] %v2007_v63  ;;  %v1150_v8 = vadd.f32 %v1149_v1, %v2687_v25  ;;  %v1502_v9 = vpop.f32.mrf.mxu0 }
 0x14d   : > { %v1542_v10 = vpop.f32.mrf.mxu1  ;;  %v1992_v12 = vpack.c.bf16 %v721_v7, %v719_v4  ;;  %v1503_v16 = vadd.f32 %v1502_v9, %v2796_v2 }
 0x14e   : > { %v2008_v13 = vpack.c.bf16 %v1150_v8, %v1148_v5  ;;  %v1504_v11 = vpop.f32.mrf.mxu0  ;;  %v1543_v15 = vadd.f32 %v1542_v10, %v2796_v2 }
 0x14f   : > { %v1544_v14 = vpop.f32.mrf.mxu1  ;;  %834 = vst [vmem:[%s2700_s29 + $0x78] sm:$0xff] %v1992_v12  ;;  %v1505_v22 = vadd.f32 %v1504_v11, %v2799_v3 }
 0x150   : > { %1263 = vst [vmem:[%s2706_s12 + $0x78] sm:$0xff] %v2008_v13  ;;  %v1545_v23 = vadd.f32 %v1544_v14, %v2799_v3  ;;  %v1506_v24 = vpop.f32.mrf.mxu0 }
 0x151   : > { %v1546_v25 = vpop.f32.mrf.mxu1  ;;  %v2009_v17 = vpack.c.bf16 %v1505_v22, %v1503_v16  ;;  %v1507_v6 = vadd.f32 %v1506_v24, %v2796_v2 }
 0x152   : > { %v2017_v18 = vpack.c.bf16 %v1545_v23, %v1543_v15  ;;  %v1508_v19 = vpop.f32.mrf.mxu0  ;;  %v1547_v20 = vadd.f32 %v1546_v25, %v2796_v2 }
 0x153   : > { %v1548_v51 = vpop.f32.mrf.mxu1  ;;  %1677 = vst [vmem:[%s2817_s17] sm:$0xff] %v2009_v17  ;;  %v1509_v21 = vadd.f32 %v1508_v19, %v2799_v3 }
 0x154   : > { %1685 = vst [vmem:[%s2817_s17 + $0x40] sm:$0xff] %v2017_v18  ;;  %v1549_v26 = vadd.f32 %v1548_v51, %v2799_v3  ;;  %v1512_v27 = vpop.f32.mrf.mxu0 }
 0x155   : > { %v1552_v28 = vpop.f32.mrf.mxu1  ;;  %v2010_v29 = vpack.c.bf16 %v1509_v21, %v1507_v6  ;;  %v1513_v33 = vadd.f32 %v1512_v27, %v2796_v2 }
 0x156   : > { %v2018_v30 = vpack.c.bf16 %v1549_v26, %v1547_v20  ;;  %v1514_v31 = vpop.f32.mrf.mxu0  ;;  %v1553_v34 = vadd.f32 %v1552_v28, %v2796_v2 }
 0x157   : > { %v1554_v32 = vpop.f32.mrf.mxu1  ;;  %1678 = vst [vmem:[%s2817_s17 + $0x8] sm:$0xff] %v2010_v29  ;;  %v1515_v35 = vadd.f32 %v1514_v31, %v2799_v3 }
 0x158   : > { %1686 = vst [vmem:[%s2817_s17 + $0x48] sm:$0xff] %v2018_v30  ;;  %v1555_v36 = vadd.f32 %v1554_v32, %v2799_v3  ;;  %v1516_v37 = vpop.f32.mrf.mxu0 }
 0x159   : > { %v1556_v38 = vpop.f32.mrf.mxu1  ;;  %v2011_v39 = vpack.c.bf16 %v1515_v35, %v1513_v33  ;;  %v1517_v43 = vadd.f32 %v1516_v37, %v2796_v2 }
 0x15a   : > { %v2019_v40 = vpack.c.bf16 %v1555_v36, %v1553_v34  ;;  %v1518_v41 = vpop.f32.mrf.mxu0  ;;  %v1557_v44 = vadd.f32 %v1556_v38, %v2796_v2 }
 0x15b   : > { %v1558_v42 = vpop.f32.mrf.mxu1  ;;  %1679 = vst [vmem:[%s2817_s17 + $0x10] sm:$0xff] %v2011_v39  ;;  %v1519_v45 = vadd.f32 %v1518_v41, %v2799_v3 }
 0x15c   : > { %1687 = vst [vmem:[%s2817_s17 + $0x50] sm:$0xff] %v2019_v40  ;;  %v1559_v46 = vadd.f32 %v1558_v42, %v2799_v3  ;;  %v1522_v47 = vpop.f32.mrf.mxu0 }
 0x15d   : > { %v1562_v48 = vpop.f32.mrf.mxu1  ;;  %v2012_v49 = vpack.c.bf16 %v1519_v45, %v1517_v43  ;;  %v1523_v54 = vadd.f32 %v1522_v47, %v2796_v2 }
 0x15e   : > { %v2020_v50 = vpack.c.bf16 %v1559_v46, %v1557_v44  ;;  %v1524_v52 = vpop.f32.mrf.mxu0  ;;  %v1563_v55 = vadd.f32 %v1562_v48, %v2796_v2 }
 0x15f   : > { %v1564_v53 = vpop.f32.mrf.mxu1  ;;  %1680 = vst [vmem:[%s2817_s17 + $0x18] sm:$0xff] %v2012_v49  ;;  %v1525_v56 = vadd.f32 %v1524_v52, %v2799_v3 }
 0x160   : > { %1688 = vst [vmem:[%s2817_s17 + $0x58] sm:$0xff] %v2020_v50  ;;  %v1565_v57 = vadd.f32 %v1564_v53, %v2799_v3  ;;  %v1526_v58 = vpop.f32.mrf.mxu0 }
 0x161   : > { %v1566_v59 = vpop.f32.mrf.mxu1  ;;  %v2013_v60 = vpack.c.bf16 %v1525_v56, %v1523_v54  ;;  %v1527_v0 = vadd.f32 %v1526_v58, %v2796_v2 }
 0x162   : > { %v2021_v61 = vpack.c.bf16 %v1565_v57, %v1563_v55  ;;  %v1528_v62 = vpop.f32.mrf.mxu0  ;;  %v1567_v1 = vadd.f32 %v1566_v59, %v2796_v2 }
 0x163   : > { %v1568_v63 = vpop.f32.mrf.mxu1  ;;  %1681 = vst [vmem:[%s2817_s17 + $0x20] sm:$0xff] %v2013_v60  ;;  %v1529_v4 = vadd.f32 %v1528_v62, %v2799_v3 }
 0x164   : > { %1689 = vst [vmem:[%s2817_s17 + $0x60] sm:$0xff] %v2021_v61  ;;  %v1569_v5 = vadd.f32 %v1568_v63, %v2799_v3  ;;  %v1532_v7 = vpop.f32.mrf.mxu0 }
 0x165   : > { %v1572_v8 = vpop.f32.mrf.mxu1  ;;  %v2014_v9 = vpack.c.bf16 %v1529_v4, %v1527_v0  ;;  %v1533_v11 = vadd.f32 %v1532_v7, %v2796_v2 }
 0x166   : > { %v2022_v10 = vpack.c.bf16 %v1569_v5, %v1567_v1  ;;  %v1534_v12 = vpop.f32.mrf.mxu0  ;;  %v1573_v14 = vadd.f32 %v1572_v8, %v2796_v2 }
 0x167   : > { %v1574_v13 = vpop.f32.mrf.mxu1  ;;  %1682 = vst [vmem:[%s2817_s17 + $0x28] sm:$0xff] %v2014_v9  ;;  %v1535_v16 = vadd.f32 %v1534_v12, %v2799_v3 }
 0x168   : > { %1690 = vst [vmem:[%s2817_s17 + $0x68] sm:$0xff] %v2022_v10  ;;  %v1575_v15 = vadd.f32 %v1574_v13, %v2799_v3  ;;  %v1536_v22 = vpop.f32.mrf.mxu0 }
 0x169   : > { %v1576_v23 = vpop.f32.mrf.mxu1  ;;  %v2015_v24 = vpack.c.bf16 %v1535_v16, %v1533_v11  ;;  %v1537_v19 = vadd.f32 %v1536_v22, %v2796_v2 }
 0x16a   : > { %v2023_v25 = vpack.c.bf16 %v1575_v15, %v1573_v14  ;;  %v1538_v17 = vpop.f32.mrf.mxu0  ;;  %v1577_v51 = vadd.f32 %v1576_v23, %v2796_v2 }
 0x16b   : > { %v1578_v18 = vpop.f32.mrf.mxu1  ;;  %1683 = vst [vmem:[%s2817_s17 + $0x30] sm:$0xff] %v2015_v24  ;;  %v1539_v6 = vadd.f32 %v1538_v17, %v2799_v3 }
 0x16c   : > { %1691 = vst [vmem:[%s2817_s17 + $0x70] sm:$0xff] %v2023_v25  ;;  %v1579_v20 = vadd.f32 %v1578_v18, %v2799_v3 }
 0x16d   : > { %v2016_v21 = vpack.c.bf16 %v1539_v6, %v1537_v19 }
 0x16e   : > { %v2024_v26 = vpack.c.bf16 %v1579_v20, %v1577_v51 }
 0x16f   : > { %1684 = vst [vmem:[%s2817_s17 + $0x38] sm:$0xff] %v2016_v21 }
 0x170   : > { %1692 = vst [vmem:[%s2817_s17 + $0x78] sm:$0xff] %v2024_v26 }
 0x171 PF: > { %s20_s30 = sadd.s32 1, %s2215_s30  }
 0x172   : > { %p17_p4 = scmp.ge.s32.totalorder %s20_s30, 4  }
 0x174   :  { %19 = sbr.rel (!%p17_p4) target bundleno = 1 (0x1), region = 102 }

</bundles_post_ra>
